<compile_context>
chip_gen: v6e
topology: v6e:2x2x1
jax: 0.10.0
libtpu: 0.0.40
codegen_flags: <defaults>
</compile_context>

<pallas_src>
import functools

import jax
import jax.numpy as jnp
import numpy as np
from jax.experimental import pallas as pl
from jax.experimental.pallas import tpu as pltpu

# ---------------------------------------------------------------------------
# Model hyper-parameters (module defaults: heads=4, dim_head=32; embed_dim=8).
# ---------------------------------------------------------------------------
EMBED_DIM = 8
HEADS = 4
DIM_HEAD = 32
HIDDEN = HEADS * DIM_HEAD          # 128
RMS_EPS = 1e-12                    # F.normalize default eps


# ---------------------------------------------------------------------------
# Pallas kernel.  One grid step processes `bblk` batch elements (1 on v7x,
# the whole batch on single-TC v5e / v6e).  Channels-first layout: x block is
# (bblk, C, N) with N on the lane axis.
# ---------------------------------------------------------------------------
def _linear_attention_kernel(x_ref, mask_ref, wq_ref, wk_ref, wv_ref,
                             wout_ref, bout_ref, gs_ref, o_ref,
                             *, heads, dim_head, scale):
    bblk = x_ref.shape[0]
    hidden = heads * dim_head
    n = x_ref.shape[-1]

    mask = mask_ref[...]           # (hidden, hidden) f32 block-diag {0,1}
    wq = wq_ref[...]               # (hidden, C) bf16, PyTorch (out, in) layout
    wk = wk_ref[...]               # (hidden, C) bf16
    wv = wv_ref[...]               # (hidden, C) bf16
    wout = wout_ref[...]           # (C, hidden) bf16
    bout = bout_ref[...]           # (C, 1) f32
    gs = gs_ref[...]               # (C, 1) f32  == g * sqrt(C)

    for i in range(bblk):          # trace-time unrolled (1 or B iterations)
        x = x_ref[i].astype(jnp.bfloat16)                              # (C, N)

        # ---- k: 1x1 conv + softmax over the sequence (lane axis) -----------
        k_h = jnp.dot(wk, x, preferred_element_type=jnp.float32)       # (hid, N)
        k_h = jnp.exp(k_h - jnp.max(k_h, axis=1, keepdims=True))
        k_h = k_h * pl.reciprocal(jnp.sum(k_h, axis=1, keepdims=True),
                                  approx=False)                        # exact
        kb = k_h.astype(jnp.bfloat16)

        # ---- v: 1x1 conv ----------------------------------------------------
        vb = jnp.dot(wv, x,
                     preferred_element_type=jnp.float32).astype(jnp.bfloat16)

        # ---- q: 1x1 conv + softmax over dim_head (sublane groups) ----------
        q_h = jnp.dot(wq, x, preferred_element_type=jnp.float32)       # (hid, N)
        q3 = q_h.reshape(heads, dim_head, n)                           # (h, D, N)
        q3 = jnp.exp(q3 - jnp.max(q3, axis=1, keepdims=True))
        q3 = q3 * (scale * pl.reciprocal(jnp.sum(q3, axis=1, keepdims=True),
                                         approx=True))                 # EUP slot
        qb = q3.reshape(hidden, n).astype(jnp.bfloat16)

        # ---- linear attention as full-width matmuls + block-diag mask ------
        # ctx[h*D+e, h'*D+d] = sum_n v[h,e,n] * k[h',d,n]; mask keeps h == h'.
        ctx = jax.lax.dot_general(vb, kb, (((1,), (1,)), ((), ())),
                                  preferred_element_type=jnp.float32)  # (hid, hid)
        ctxb = (ctx * mask).astype(jnp.bfloat16)
        # out_h[h*D+e, n] = sum_d ctx[h*D+e, h*D+d] * q[h*D+d, n]
        out_h = jnp.dot(ctxb, qb, preferred_element_type=jnp.float32)  # (hid, N)

        # ---- to_out[0]: 1x1 conv with bias ----------------------------------
        y = jnp.dot(wout, out_h.astype(jnp.bfloat16),
                    preferred_element_type=jnp.float32) + bout         # (C, N)

        # ---- to_out[1]: RMSNorm over channels, per spatial position --------
        # == F.normalize(y, dim=channel) * g * sqrt(C)
        ss = jnp.sum(y * y, axis=0, keepdims=True)                     # (1, N)
        inv = jax.lax.rsqrt(jnp.maximum(ss, jnp.float32(RMS_EPS * RMS_EPS)))
        o_ref[i] = y * inv * gs


# ---------------------------------------------------------------------------
# Chip gating: fold B into one grid step only on single-TensorCore chips.
# ---------------------------------------------------------------------------
def _fold_batch_for_this_chip() -> bool:
    try:
        kind = jax.devices()[0].device_kind.lower()
    except Exception:
        return False
    single_tc_tags = ("v5e", "v5 lite", "v5litepod", "v6e", "v6 lite")
    return any(tag in kind for tag in single_tc_tags)


# ---------------------------------------------------------------------------
# Wrapper: pure reshapes + weight split/cast, then pallas_call.
# ---------------------------------------------------------------------------
def linear_attention_pallas(x_nchw, wqkv_oc, wout_oc, bout, g,
                            *, heads=HEADS, dim_head=DIM_HEAD, fold_batch=None):
    B, C, H, W = x_nchw.shape
    N = H * W
    hidden = heads * dim_head
    assert wqkv_oc.shape == (3 * hidden, C)
    assert wout_oc.shape == (C, hidden)
    # Lane/sublane alignment for the channels-first blocks (holds for 16x16, C=8).
    assert N % 128 == 0 and C % 8 == 0

    if fold_batch is None:
        fold_batch = _fold_batch_for_this_chip()
    bblk = B if fold_batch else 1
    grid = (B // bblk,)

    x_bcn = x_nchw.reshape(B, C, N).astype(jnp.float32)          # pure reshape

    # Split fused qkv weights (PyTorch chunk order q, k, v) and cast to bf16.
    wq = wqkv_oc[0 * hidden:1 * hidden].astype(jnp.bfloat16)
    wk = wqkv_oc[1 * hidden:2 * hidden].astype(jnp.bfloat16)
    wv = wqkv_oc[2 * hidden:3 * hidden].astype(jnp.bfloat16)
    wout_bf = wout_oc.astype(jnp.bfloat16)

    # Block-diagonal head mask (rows//D == cols//D), built once in the wrapper.
    head_id = jnp.arange(hidden, dtype=jnp.int32) // dim_head
    bd_mask = (head_id[:, None] == head_id[None, :]).astype(jnp.float32)

    bout2 = bout.reshape(C, 1).astype(jnp.float32)
    gs = (g.astype(jnp.float32) * np.sqrt(float(C))).reshape(C, 1)

    kernel = functools.partial(
        _linear_attention_kernel,
        heads=heads, dim_head=dim_head, scale=dim_head ** (-0.5))

    out_bcn = pl.pallas_call(
        kernel,
        out_shape=jax.ShapeDtypeStruct((B, C, N), jnp.float32),
        grid_spec=pltpu.PrefetchScalarGridSpec(
            num_scalar_prefetch=0,
            grid=grid,
            in_specs=[
                pl.BlockSpec((bblk, C, N), lambda b: (b, 0, 0)),       # x
                pl.BlockSpec((hidden, hidden), lambda b: (0, 0)),      # head mask
                pl.BlockSpec((hidden, C), lambda b: (0, 0)),           # W_q
                pl.BlockSpec((hidden, C), lambda b: (0, 0)),           # W_k
                pl.BlockSpec((hidden, C), lambda b: (0, 0)),           # W_v
                pl.BlockSpec((C, hidden), lambda b: (0, 0)),           # W_out
                pl.BlockSpec((C, 1), lambda b: (0, 0)),                # bias_out
                pl.BlockSpec((C, 1), lambda b: (0, 0)),                # g*sqrt(C)
            ],
            out_specs=pl.BlockSpec((bblk, C, N), lambda b: (b, 0, 0)),
        ),
        compiler_params=pltpu.CompilerParams(
            dimension_semantics=("parallel",)),
    )(x_bcn, bd_mask, wq, wk, wv, wout_bf, bout2, gs)

    return out_bcn.reshape(B, C, H, W)                           # pure reshape


# ---------------------------------------------------------------------------
# Pure-JAX f32 reference mirroring the PyTorch forward exactly (NCHW path).
# ---------------------------------------------------------------------------
def linear_attention_reference(x_nchw, wqkv_oc, wout_oc, bout, g,
                               *, heads=HEADS, dim_head=DIM_HEAD):
    b, c, h, w = x_nchw.shape
    hidden = heads * dim_head
    n = h * w
    xn = x_nchw.reshape(b, c, n)                                   # (B, C, N)
    qkv = jnp.einsum('oc,bcn->bon', wqkv_oc, xn)                   # (B, 3*hid, N)
    q, k, v = jnp.split(qkv, 3, axis=1)
    resh = lambda t: t.reshape(b, heads, dim_head, n)              # b h d n
    q, k, v = resh(q), resh(k), resh(v)
    q = jax.nn.softmax(q, axis=-2) * (dim_head ** (-0.5))
    k = jax.nn.softmax(k, axis=-1)
    context = jnp.einsum('bhdn,bhen->bhde', k, v)
    out = jnp.einsum('bhde,bhdn->bhen', context, q)
    out = out.reshape(b, hidden, n)
    y = jnp.einsum('oc,bcn->bon', wout_oc, out) + bout[None, :, None]
    norm = jnp.sqrt(jnp.sum(y * y, axis=1, keepdims=True))
    y = y / jnp.maximum(norm, RMS_EPS)
    y = y * g[None, :, None] * jnp.sqrt(jnp.float32(c))
    return y.reshape(b, c, h, w)


if __name__ == "__main__":
    key = jax.random.PRNGKey(0)
    k_x, k_wqkv, k_wout, k_bout = jax.random.split(key, 4)

    B, C, H, W = 2, EMBED_DIM, 16, 16

    x = jax.random.normal(k_x, (B, C, H, W), dtype=jnp.float32)

    # PyTorch Conv2d 1x1 weight layout (out, in, 1, 1) -> stored as (out, in).
    wqkv_oc = jax.random.normal(k_wqkv, (3 * HIDDEN, C), dtype=jnp.float32) * 0.1
    wout_oc = jax.random.normal(k_wout, (C, HIDDEN), dtype=jnp.float32) * 0.1
    bout = jax.random.normal(k_bout, (C,), dtype=jnp.float32) * 0.1
    g = jnp.ones((C,), dtype=jnp.float32)   # RMSNorm default init

    out_pallas = linear_attention_pallas(x, wqkv_oc, wout_oc, bout, g)
    out_pallas = jax.block_until_ready(out_pallas)

    out_ref = linear_attention_reference(x, wqkv_oc, wout_oc, bout, g)
    out_ref = jax.block_until_ready(out_ref)

    # bf16 MXU operands + the approx EUP reciprocal in the q-softmax give
    # ~1e-3 absolute error at these shapes; 1e-2 still catches any structural
    # (axis / scale / layout / masking) error, which would be O(0.1-1).
    np.testing.assert_allclose(np.asarray(out_pallas), np.asarray(out_ref),
                               rtol=1e-2, atol=1e-2)
    print("KERNEL_OK")
</pallas_src>

<mosaic_0001>
module attributes {stable_mosaic.version = 11 : i64} {
  func.func @_linear_attention_kernel(%arg0: i32, %arg1: memref<1x8x256xf32, #tpu.memory_space<vmem>>, %arg2: memref<128x128xf32, #tpu.memory_space<vmem>>, %arg3: memref<128x8xbf16, #tpu.memory_space<vmem>>, %arg4: memref<128x8xbf16, #tpu.memory_space<vmem>>, %arg5: memref<128x8xbf16, #tpu.memory_space<vmem>>, %arg6: memref<8x128xbf16, #tpu.memory_space<vmem>>, %arg7: memref<8x1xf32, #tpu.memory_space<vmem>>, %arg8: memref<8x1xf32, #tpu.memory_space<vmem>>, %arg9: memref<1x8x256xf32, #tpu.memory_space<vmem>>) attributes {dimension_semantics = [#tpu.dimension_semantics<parallel>], iteration_bounds = array<i64: 2>, scalar_prefetch = 0 : i64, scratch_operands = 0 : i64, tpu.core_type = #tpu.core_type<tc>, window_params = [{transform_indices = @transform_0, window_bounds = array<i64: 1, 8, 256>}, {pipeline_mode = #tpu.pipeline_mode<synchronous>, transform_indices = @transform_1, window_bounds = array<i64: 128, 128>}, {pipeline_mode = #tpu.pipeline_mode<synchronous>, transform_indices = @transform_2, window_bounds = array<i64: 128, 8>}, {pipeline_mode = #tpu.pipeline_mode<synchronous>, transform_indices = @transform_3, window_bounds = array<i64: 128, 8>}, {pipeline_mode = #tpu.pipeline_mode<synchronous>, transform_indices = @transform_4, window_bounds = array<i64: 128, 8>}, {pipeline_mode = #tpu.pipeline_mode<synchronous>, transform_indices = @transform_5, window_bounds = array<i64: 8, 128>}, {pipeline_mode = #tpu.pipeline_mode<synchronous>, transform_indices = @transform_6, window_bounds = array<i64: 8, 1>}, {pipeline_mode = #tpu.pipeline_mode<synchronous>, transform_indices = @transform_7, window_bounds = array<i64: 8, 1>}, {transform_indices = @transform_8, window_bounds = array<i64: 1, 8, 256>}]} {
    %c0 = arith.constant 0 : index
    %c0_0 = arith.constant 0 : index
    %0 = vector.load %arg2[%c0, %c0_0] : memref<128x128xf32, #tpu.memory_space<vmem>>, vector<128x128xf32>
    %c0_1 = arith.constant 0 : index
    %c0_2 = arith.constant 0 : index
    %1 = vector.load %arg3[%c0_1, %c0_2] : memref<128x8xbf16, #tpu.memory_space<vmem>>, vector<128x8xbf16>
    %c0_3 = arith.constant 0 : index
    %c0_4 = arith.constant 0 : index
    %2 = vector.load %arg4[%c0_3, %c0_4] : memref<128x8xbf16, #tpu.memory_space<vmem>>, vector<128x8xbf16>
    %c0_5 = arith.constant 0 : index
    %c0_6 = arith.constant 0 : index
    %3 = vector.load %arg5[%c0_5, %c0_6] : memref<128x8xbf16, #tpu.memory_space<vmem>>, vector<128x8xbf16>
    %c0_7 = arith.constant 0 : index
    %c0_8 = arith.constant 0 : index
    %4 = vector.load %arg6[%c0_7, %c0_8] : memref<8x128xbf16, #tpu.memory_space<vmem>>, vector<8x128xbf16>
    %c0_9 = arith.constant 0 : index
    %c0_10 = arith.constant 0 : index
    %5 = vector.load %arg7[%c0_9, %c0_10] : memref<8x1xf32, #tpu.memory_space<vmem>>, vector<8x1xf32>
    %c0_11 = arith.constant 0 : index
    %c0_12 = arith.constant 0 : index
    %6 = vector.load %arg8[%c0_11, %c0_12] : memref<8x1xf32, #tpu.memory_space<vmem>>, vector<8x1xf32>
    %c0_13 = arith.constant 0 : index
    %c0_14 = arith.constant 0 : index
    %c0_15 = arith.constant 0 : index
    %7 = vector.load %arg1[%c0_13, %c0_14, %c0_15] : memref<1x8x256xf32, #tpu.memory_space<vmem>>, vector<1x8x256xf32>
    %8 = vector.shape_cast %7 : vector<1x8x256xf32> to vector<8x256xf32>
    %9 = arith.truncf %8 : vector<8x256xf32> to vector<8x256xbf16>
    %cst = arith.constant dense<0.000000e+00> : vector<128x256xf32>
    %10 = tpu.matmul %2, %9, %cst {dimension_numbers = #tpu.dot_dimension_numbers<[1], [0], [0], [1], [0, 0, 1, 1], [], []>} : vector<128x8xbf16>, vector<8x256xbf16>, vector<128x256xf32> -> vector<128x256xf32>
    %cst_16 = arith.constant dense<0xFF800000> : vector<128xf32>
    %11 = vector.multi_reduction <maximumf>, %10, %cst_16 [1] : vector<128x256xf32> to vector<128xf32>
    %12 = vector.shape_cast %11 : vector<128xf32> to vector<128x1xf32>
    %13 = vector.broadcast %12 : vector<128x1xf32> to vector<128x256xf32>
    %14 = arith.subf %10, %13 : vector<128x256xf32>
    %15 = math.exp %14 : vector<128x256xf32>
    %cst_17 = arith.constant dense<0.000000e+00> : vector<128xf32>
    %16 = vector.multi_reduction <add>, %15, %cst_17 [1] : vector<128x256xf32> to vector<128xf32>
    %17 = vector.shape_cast %16 : vector<128xf32> to vector<128x1xf32>
    %18 = tpu.reciprocal %17 : vector<128x1xf32> -> vector<128x1xf32>
    %19 = vector.broadcast %18 : vector<128x1xf32> to vector<128x256xf32>
    %20 = arith.mulf %15, %19 : vector<128x256xf32>
    %21 = arith.truncf %20 : vector<128x256xf32> to vector<128x256xbf16>
    %cst_18 = arith.constant dense<0.000000e+00> : vector<128x256xf32>
    %22 = tpu.matmul %3, %9, %cst_18 {dimension_numbers = #tpu.dot_dimension_numbers<[1], [0], [0], [1], [0, 0, 1, 1], [], []>} : vector<128x8xbf16>, vector<8x256xbf16>, vector<128x256xf32> -> vector<128x256xf32>
    %23 = arith.truncf %22 : vector<128x256xf32> to vector<128x256xbf16>
    %cst_19 = arith.constant dense<0.000000e+00> : vector<128x256xf32>
    %24 = tpu.matmul %1, %9, %cst_19 {dimension_numbers = #tpu.dot_dimension_numbers<[1], [0], [0], [1], [0, 0, 1, 1], [], []>} : vector<128x8xbf16>, vector<8x256xbf16>, vector<128x256xf32> -> vector<128x256xf32>
    %25 = vector.shape_cast %24 : vector<128x256xf32> to vector<4x32x256xf32>
    %cst_20 = arith.constant dense<0xFF800000> : vector<4x256xf32>
    %26 = vector.multi_reduction <maximumf>, %25, %cst_20 [1] : vector<4x32x256xf32> to vector<4x256xf32>
    %27 = vector.shape_cast %26 : vector<4x256xf32> to vector<4x1x256xf32>
    %28 = vector.broadcast %27 : vector<4x1x256xf32> to vector<4x32x256xf32>
    %29 = arith.subf %25, %28 : vector<4x32x256xf32>
    %30 = math.exp %29 : vector<4x32x256xf32>
    %cst_21 = arith.constant dense<0.000000e+00> : vector<4x256xf32>
    %31 = vector.multi_reduction <add>, %30, %cst_21 [1] : vector<4x32x256xf32> to vector<4x256xf32>
    %32 = vector.shape_cast %31 : vector<4x256xf32> to vector<4x1x256xf32>
    %33 = tpu.reciprocal %32 {approx = true} : vector<4x1x256xf32> -> vector<4x1x256xf32>
    %cst_22 = arith.constant 0.176776692 : f32
    %34 = vector.broadcast %cst_22 : f32 to vector<4x1x256xf32>
    %35 = arith.mulf %34, %33 : vector<4x1x256xf32>
    %36 = vector.broadcast %35 : vector<4x1x256xf32> to vector<4x32x256xf32>
    %37 = arith.mulf %30, %36 : vector<4x32x256xf32>
    %38 = vector.shape_cast %37 : vector<4x32x256xf32> to vector<128x256xf32>
    %39 = arith.truncf %38 : vector<128x256xf32> to vector<128x256xbf16>
    %cst_23 = arith.constant dense<0.000000e+00> : vector<128x128xf32>
    %40 = tpu.matmul %23, %21, %cst_23 {dimension_numbers = #tpu.dot_dimension_numbers<[1], [1], [0], [0], [0, 0, 1, 0], [], []>} : vector<128x256xbf16>, vector<128x256xbf16>, vector<128x128xf32> -> vector<128x128xf32>
    %41 = arith.mulf %40, %0 : vector<128x128xf32>
    %42 = arith.truncf %41 : vector<128x128xf32> to vector<128x128xbf16>
    %cst_24 = arith.constant dense<0.000000e+00> : vector<128x256xf32>
    %43 = tpu.matmul %42, %39, %cst_24 {dimension_numbers = #tpu.dot_dimension_numbers<[1], [0], [0], [1], [0, 0, 1, 1], [], []>} : vector<128x128xbf16>, vector<128x256xbf16>, vector<128x256xf32> -> vector<128x256xf32>
    %44 = arith.truncf %43 : vector<128x256xf32> to vector<128x256xbf16>
    %cst_25 = arith.constant dense<0.000000e+00> : vector<8x256xf32>
    %45 = tpu.matmul %4, %44, %cst_25 {dimension_numbers = #tpu.dot_dimension_numbers<[1], [0], [0], [1], [0, 0, 1, 1], [], []>} : vector<8x128xbf16>, vector<128x256xbf16>, vector<8x256xf32> -> vector<8x256xf32>
    %46 = vector.broadcast %5 : vector<8x1xf32> to vector<8x256xf32>
    %47 = arith.addf %45, %46 : vector<8x256xf32>
    %48 = arith.mulf %47, %47 : vector<8x256xf32>
    %cst_26 = arith.constant dense<0.000000e+00> : vector<256xf32>
    %49 = vector.multi_reduction <add>, %48, %cst_26 [0] : vector<8x256xf32> to vector<256xf32>
    %50 = vector.shape_cast %49 : vector<256xf32> to vector<1x256xf32>
    %cst_27 = arith.constant 1.000000e-24 : f32
    %51 = vector.broadcast %cst_27 : f32 to vector<1x256xf32>
    %52 = arith.maximumf %50, %51 : vector<1x256xf32>
    %53 = math.rsqrt %52 : vector<1x256xf32>
    %54 = vector.broadcast %53 : vector<1x256xf32> to vector<8x256xf32>
    %55 = arith.mulf %47, %54 : vector<8x256xf32>
    %56 = vector.broadcast %6 : vector<8x1xf32> to vector<8x256xf32>
    %57 = arith.mulf %55, %56 : vector<8x256xf32>
    %c0_28 = arith.constant 0 : index
    %c0_29 = arith.constant 0 : index
    %c0_30 = arith.constant 0 : index
    %58 = vector.load %arg9[%c0_28, %c0_29, %c0_30] : memref<1x8x256xf32, #tpu.memory_space<vmem>>, vector<1x8x256xf32>
    %59 = vector.shape_cast %58 : vector<1x8x256xf32> to vector<8x256xf32>
    %60 = vector.shape_cast %57 : vector<8x256xf32> to vector<1x8x256xf32>
    tpu.vector_store %arg9[%c0_28, %c0_29, %c0_30], %60 {strides = array<i32>} : memref<1x8x256xf32, #tpu.memory_space<vmem>>, vector<1x8x256xf32>,
    return
  }
  func.func @transform_0(%arg0: i32) -> (i32, i32, i32) {
    %c0_i32 = arith.constant 0 : i32
    %c0_i32_0 = arith.constant 0 : i32
    %c0_i32_1 = arith.constant 0 : i32
    return %arg0, %c0_i32, %c0_i32_0 : i32, i32, i32
  }
  func.func @transform_1(%arg0: i32) -> (i32, i32) {
    %c0_i32 = arith.constant 0 : i32
    %c0_i32_0 = arith.constant 0 : i32
    %c0_i32_1 = arith.constant 0 : i32
    return %c0_i32, %c0_i32_0 : i32, i32
  }
  func.func @transform_2(%arg0: i32) -> (i32, i32) {
    %c0_i32 = arith.constant 0 : i32
    %c0_i32_0 = arith.constant 0 : i32
    %c0_i32_1 = arith.constant 0 : i32
    return %c0_i32, %c0_i32_0 : i32, i32
  }
  func.func @transform_3(%arg0: i32) -> (i32, i32) {
    %c0_i32 = arith.constant 0 : i32
    %c0_i32_0 = arith.constant 0 : i32
    %c0_i32_1 = arith.constant 0 : i32
    return %c0_i32, %c0_i32_0 : i32, i32
  }
  func.func @transform_4(%arg0: i32) -> (i32, i32) {
    %c0_i32 = arith.constant 0 : i32
    %c0_i32_0 = arith.constant 0 : i32
    %c0_i32_1 = arith.constant 0 : i32
    return %c0_i32, %c0_i32_0 : i32, i32
  }
  func.func @transform_5(%arg0: i32) -> (i32, i32) {
    %c0_i32 = arith.constant 0 : i32
    %c0_i32_0 = arith.constant 0 : i32
    %c0_i32_1 = arith.constant 0 : i32
    return %c0_i32, %c0_i32_0 : i32, i32
  }
  func.func @transform_6(%arg0: i32) -> (i32, i32) {
    %c0_i32 = arith.constant 0 : i32
    %c0_i32_0 = arith.constant 0 : i32
    %c0_i32_1 = arith.constant 0 : i32
    return %c0_i32, %c0_i32_0 : i32, i32
  }
  func.func @transform_7(%arg0: i32) -> (i32, i32) {
    %c0_i32 = arith.constant 0 : i32
    %c0_i32_0 = arith.constant 0 : i32
    %c0_i32_1 = arith.constant 0 : i32
    return %c0_i32, %c0_i32_0 : i32, i32
  }
  func.func @transform_8(%arg0: i32) -> (i32, i32, i32) {
    %c0_i32 = arith.constant 0 : i32
    %c0_i32_0 = arith.constant 0 : i32
    %c0_i32_1 = arith.constant 0 : i32
    return %arg0, %c0_i32, %c0_i32_0 : i32, i32, i32
  }
}

</mosaic_0001>

<bundles_post_ra>
// kernel: tpu_custom_call.1
= control target key start
LH: loop header
LB: loop body
LE: loop exit
PB: predicated region body
PF: predicated region fallthrough
CT: control target
= control target key end

     0   :  { %13 = vsyncpa [#allocation3], 0  ;;  %s3116_s0 = inlined_call_operand.vmem [shape: f32[2,8,256], index: 0, kind: input, shape index: {}]   ;;  %s3117_s1 = inlined_call_operand.vmem [shape: f32[128,128], index: 1, kind: input, shape index: {}]   ;;  %s3118_s2 = inlined_call_operand.vmem [shape: bf16[128,8], index: 2, kind: input, shape index: {}]   ;;  %s3119_s3 = inlined_call_operand.vmem [shape: bf16[128,8], index: 3, kind: input, shape index: {}]   ;;  %s3120_s4 = inlined_call_operand.vmem [shape: bf16[128,8], index: 4, kind: input, shape index: {}]   ;;  %s3121_s5 = inlined_call_operand.vmem [shape: bf16[8,128], index: 5, kind: input, shape index: {}]   ;;  %s3122_s6 = inlined_call_operand.vmem [shape: f32[8,1], index: 6, kind: input, shape index: {}]   ;;  %s3123_s7 = inlined_call_operand.vmem [shape: f32[8,1], index: 7, kind: input, shape index: {}]   ;;  %s3124_s8 = inlined_call_operand.hbm [shape: f32[2,8,256], index: 8, kind: output, shape index: {}]  }
   0x1   :  { %15 = vsyncpa [#allocation3 + $0x1], 0  ;;  %s2312_s27 = smov 0   ;;  %s2314_s28 = smov 0  }
   0x2   :  { %s2316_s29 = smov 0   ;;  %s2318_s30 = smov 0  }
   0x3 LB: > { %s2333_s9 = sadd.s32 4294967295, %s2263_s30   ;;  %s1890_s10 = sadd.s32 4294967294, %s2263_s30   ;;  %s2263_s30 = sphi %s2318_s30, %s3224_s30   ;;  %s2259_s29 = sphi %s2316_s29, %s3223_s29   ;;  %s2255_s28 = sphi %s2314_s28, %s3222_s28   ;;  %s2251_s27 = sphi %s2312_s27, %s3221_s27  }
   0x4   : > { %s2337_s11 = sadd.s32 1, %s2263_s30   ;;  %s201_s12 = sadd.s32 1, %s2259_s29 }
   0x5   : > { %s198_s13 = ssub.s32 %s2263_s30, %s2337_s11  ;;  %p211_p0 = scmp.ne.s32.totalorder %s2259_s29, %s2255_s28 }
   0x6   : > { %p199_p1 = scmp.eq.s32.totalorder %s198_s13, 0  ;;  %p212_p2 = scmp.eq.s32.totalorder %s2333_s9, 1 }
   0x7   : > { %p217_p3 = scmp.ne.s32.totalorder %s2255_s28, %s2251_s27  ;;  %p218_p4 = scmp.eq.s32.totalorder %s1890_s10, 1 }
   0x8   : > { %s2348_s14 = scalar_select %p199_p1, %s2259_s29, %s201_s12  }
   0x9   : > { %p2350_p5 = por %p212_p2, %p211_p0  ;;  %p2354_p6 = por %p218_p4, %p217_p3 }
   0xa   : > { %p1893_p7 = scmp.ge.s32.totalorder %s2263_s30, 1  ;;  %p265_p8 = scmp.lt.s32.totalorder %s2263_s30, 3 }
   0xc   : > { %p266_p9 = pnand %p1893_p7, %p265_p8 }
   0xe   : > { %269 = sbr.rel (%p266_p9) target bundleno = 1362 (0x552), region = 52 }
  0x13   : > { %p299_p10 = scmp.lt.s32.totalorder %s2333_s9, 1  ;;  %v3125_v0 = vmov 0   ;;  %vm441_vm0 = vcmask 1043456   ;;  %v1999_v5 = vld [vmem:[%s3119_s3] sm:$0xff]   ;;  %vm416_vm1 = vcmask 64512   ;;  %v2000_v7 = vld [vmem:[%s3119_s3 + $0x28] sm:$0xff]  }
  0x14   : > { %480 = vmatprep.mubr.bf16.mxu0 %v3125_v0  ;;  %530 = vmatprep.mubr.bf16.mxu1 %v3125_v0  ;;  %v2001_v8 = vld [vmem:[%s3119_s3 + $0x8] sm:$0xff]   ;;  %v2002_v9 = vld [vmem:[%s3119_s3 + $0x30] sm:$0xff]   ;;  %v2004_v11 = vld [vmem:[%s3119_s3 + $0x38] sm:$0xff]   ;;  %s1954_s19 = sshll.u32 %s2333_s9, 8  ;;  %s2266_s10 = smov [#allocation2]  }
  0x15   : > { %s300_s17 = scalar_select %p299_p10, %s2333_s9, 1  ;;  %1997 = vset.pattern.permute.xlu0 %v3125_v0  ;;  %1998 = vset.pattern.permute.xlu1 %v3125_v0  ;;  %v2003_v10 = vld [vmem:[%s3119_s3 + $0x10] sm:$0xff]   ;;  %v2005_v12 = vld [vmem:[%s3119_s3 + $0x18] sm:$0xff]   ;;  %v2006_v13 = vld [vmem:[%s3119_s3 + $0x20] sm:$0xff]  }
  0x16   : > { %v2007_v14 = vld [vmem:[%s3118_s2] sm:$0xff]   ;;  %v2008_v15 = vld [vmem:[%s3118_s2 + $0x8] sm:$0xff]   ;;  %v2009_v16 = vld [vmem:[%s3118_s2 + $0x10] sm:$0xff]   ;;  %s1829_s24 = scalar_lea.hbm %s3124_s8, %s1954_s19  ;;  %s2207_s9 = sshll.u32 %s2266_s10, 4  ;;  %s2208_s9 = int_to_ptr.vmem [resolvable:$false] %s2207_s9 }
  0x17   : > { %s1953_s18 = sshll.u32 %s300_s17, 4  ;;  %v2010_v17 = vld [vmem:[%s3118_s2 + $0x18] sm:$0xff]   ;;  %v2011_v18 = vld [vmem:[%s3118_s2 + $0x20] sm:$0xff]   ;;  %v2012_v19 = vld [vmem:[%s3118_s2 + $0x28] sm:$0xff]   ;;  %s296_s17 = sand.u32 1, %s2255_s28  }
  0x18   : > { %s303_s21 = scalar_lea.vmem %s3116_s0, %s1953_s18  ;;  %v2013_v52 = vld [vmem:[%s3118_s2 + $0x30] sm:$0xff]   ;;  %v2014_v59 = vld [vmem:[%s3118_s2 + $0x38] sm:$0xff]   ;;  %s1894_s18 = sshll.u32 %s296_s17, 4 }
  0x19   : > { %v373_v1 = vld [vmem:[%s303_s21 + $0x8] sm:$0xff]  ;;  %v372_v2 = vld [vmem:[%s303_s21] sm:$0xff]  ;;  %s298_s20 = scalar_lea.vmem [#allocation2], %s1894_s18  ;;  %s1817_s25 = scalar_lea.sflag [#allocation3], %s296_s17 }
  0x1a   : > { %v375_v3 = vpack.c.bf16 %v373_v1, %v373_v1  ;;  %v374_v4 = vpack.c.bf16 %v372_v2, %v372_v2  ;;  %s1831_s21 = sshll.u32 %s298_s20, 4  ;;  %s2209_s12 = scalar_lea.vmem %s2208_s9, 512  ;;  %s1832_s21 = int_to_ptr.vmem [resolvable:$true] %s1831_s21 }
  0x1b   : > { %s2203_s26 = scalar_lea.vmem %s1832_s21, 256  ;;  %p2210_p0 = scmp.lt.s32.totalorder %s1832_s21, %s2208_s9 }
  0x1c   : > { %1905 = vmatprep.subr.msk.bf16.mxu0 %vm441_vm0, %v375_v3  ;;  %1955 = vmatprep.subr.msk.bf16.mxu1 %vm441_vm0, %v375_v3  ;;  %v443_v6 = vsel %vm441_vm0, %v374_v4, 0  ;;  %p2204_p11 = scmp.ne.s32.totalorder %s1832_s21, %s2203_s26  ;;  %p2211_p1 = scmp.lt.s32.totalorder %s2209_s12, %s2203_s26 }
  0x1d   : > { %463 = vmatpush1.bf16.msra.mxu0 %v443_v6  ;;  %1956 = vmatpush1.bf16.msra.mxu1 %v443_v6 }
  0x1e   : > { %1939 = vmatprep.subr.msk.bf16.mxu0 %vm441_vm0, %v375_v3  ;;  %1922 = vmatprep.subr.msk.bf16.mxu1 %vm441_vm0, %v375_v3  ;;  %p2205_p12 = pnand %p2204_p11, %p2350_p5  ;;  %p2212_p2 = por %p2211_p1, %p2210_p0 }
  0x20   : > { %1906 = vmatmul.mubr.msk.bf16.vlgmr.msra.gmra.mxu0 %vm416_vm1, %v1999_v5  ;;  %1911 = vmatmul.mubr.msk.bf16.vlgmr.msra.gmra.mxu1 %vm416_vm1, %v2000_v7  ;;  %v2015_v7 = vld [vmem:[%s3120_s4] sm:$0xff]   ;;  %p2206_p13 = pneg %p2205_p12 }
  0x21   : > { %490 = vmatprep.mubr.bf16.mxu0 %v3125_v0  ;;  %540 = vmatprep.mubr.bf16.mxu1 %v3125_v0 }
  0x22   : > { %1089 = vmatpush1.bf16.msra.mxu0 %v443_v6  ;;  %896 = vmatpush1.bf16.msra.mxu1 %v443_v6  ;;  %p2213_p3 = pnand %p2212_p2, %p2206_p13 }
  0x28   : > { %1907 = vmatmul.mubr.msk.bf16.gmra.mxu0 %vm416_vm1, %v2001_v8  ;;  %1912 = vmatmul.mubr.msk.bf16.gmra.mxu1 %vm416_vm1, %v2002_v9  ;;  %v2016_v8 = vld [vmem:[%s3120_s4 + $0x8] sm:$0xff]   ;;  %v2017_v9 = vld [vmem:[%s3120_s4 + $0x10] sm:$0xff]  }
  0x29   : > { %500 = vmatprep.mubr.bf16.mxu0 %v3125_v0  ;;  %550 = vmatprep.mubr.bf16.mxu1 %v3125_v0 }
  0x30   : > { %1908 = vmatmul.mubr.msk.bf16.gmra.mxu0 %vm416_vm1, %v2003_v10  ;;  %1913 = vmatmul.mubr.msk.bf16.gmra.mxu1 %vm416_vm1, %v2004_v11  ;;  %v2018_v10 = vld [vmem:[%s3120_s4 + $0x18] sm:$0xff]   ;;  %v2019_v11 = vld [vmem:[%s3120_s4 + $0x20] sm:$0xff]  }
  0x31   : > { %510 = vmatprep.mubr.bf16.mxu0 %v3125_v0  ;;  %913 = vmatprep.mubr.bf16.mxu1 %v3125_v0 }
  0x38   : > { %1909 = vmatmul.mubr.msk.bf16.gmra.mxu0 %vm416_vm1, %v2005_v12  ;;  %1923 = vmatmul.mubr.msk.bf16.vlgmr.msra.gmra.mxu1 %vm416_vm1, %v2015_v7  ;;  %v2020_v12 = vld [vmem:[%s3120_s4 + $0x28] sm:$0xff]  }
  0x39   : > { %520 = vmatprep.mubr.bf16.mxu0 %v3125_v0  ;;  %923 = vmatprep.mubr.bf16.mxu1 %v3125_v0 }
  0x40   : > { %1910 = vmatmul.mubr.msk.bf16.gmra.mxu0 %vm416_vm1, %v2006_v13  ;;  %1924 = vmatmul.mubr.msk.bf16.gmra.mxu1 %vm416_vm1, %v2016_v8  ;;  %v2021_v13 = vld [vmem:[%s3120_s4 + $0x30] sm:$0xff]  }
  0x41   : > { %1106 = vmatprep.mubr.bf16.mxu0 %v3125_v0  ;;  %933 = vmatprep.mubr.bf16.mxu1 %v3125_v0 }
  0x48   : > { %1940 = vmatmul.mubr.msk.bf16.vlgmr.msra.gmra.mxu0 %vm416_vm1, %v2007_v14  ;;  %1925 = vmatmul.mubr.msk.bf16.gmra.mxu1 %vm416_vm1, %v2017_v9  ;;  %v2022_v14 = vld [vmem:[%s3120_s4 + $0x38] sm:$0xff]  }
  0x49   : > { %1116 = vmatprep.mubr.bf16.mxu0 %v3125_v0  ;;  %943 = vmatprep.mubr.bf16.mxu1 %v3125_v0 }
  0x50   : > { %1941 = vmatmul.mubr.msk.bf16.gmra.mxu0 %vm416_vm1, %v2008_v15  ;;  %1926 = vmatmul.mubr.msk.bf16.gmra.mxu1 %vm416_vm1, %v2018_v10 }
  0x51   : > { %1126 = vmatprep.mubr.bf16.mxu0 %v3125_v0  ;;  %953 = vmatprep.mubr.bf16.mxu1 %v3125_v0 }
  0x58   : > { %1942 = vmatmul.mubr.msk.bf16.gmra.mxu0 %vm416_vm1, %v2009_v16  ;;  %1927 = vmatmul.mubr.msk.bf16.gmra.mxu1 %vm416_vm1, %v2019_v11 }
  0x59   : > { %1136 = vmatprep.mubr.bf16.mxu0 %v3125_v0  ;;  %963 = vmatprep.mubr.bf16.mxu1 %v3125_v0 }
  0x60   : > { %1943 = vmatmul.mubr.msk.bf16.gmra.mxu0 %vm416_vm1, %v2010_v17  ;;  %1928 = vmatmul.mubr.msk.bf16.gmra.mxu1 %vm416_vm1, %v2020_v12 }
  0x61   : > { %1146 = vmatprep.mubr.bf16.mxu0 %v3125_v0  ;;  %973 = vmatprep.mubr.bf16.mxu1 %v3125_v0 }
  0x68   : > { %1944 = vmatmul.mubr.msk.bf16.gmra.mxu0 %vm416_vm1, %v2011_v18  ;;  %1929 = vmatmul.mubr.msk.bf16.gmra.mxu1 %vm416_vm1, %v2021_v13 }
  0x69   : > { %1156 = vmatprep.mubr.bf16.mxu0 %v3125_v0  ;;  %983 = vmatprep.mubr.bf16.mxu1 %v3125_v0 }
  0x70   : > { %1945 = vmatmul.mubr.msk.bf16.gmra.mxu0 %vm416_vm1, %v2012_v19  ;;  %1930 = vmatmul.mubr.msk.bf16.gmra.mxu1 %vm416_vm1, %v2022_v14 }
  0x71   : > { %1166 = vmatprep.mubr.bf16.mxu0 %v3125_v0 }
  0x78   : > { %1946 = vmatmul.mubr.msk.bf16.gmra.mxu0 %vm416_vm1, %v2013_v52 }
  0x79   : > { %1176 = vmatprep.mubr.bf16.mxu0 %v3125_v0 }
  0x80   : > { %1947 = vmatmul.mubr.msk.bf16.gmra.mxu0 %vm416_vm1, %v2014_v59 }
  0x81   : > { %1644 = vmatprep.mubr.bf16.mxu0 %v3125_v0 }
  0xe0   : > { %v2439_v20 = vpop.f32.mrf.mxu0  ;;  %v2441_v21 = vpop.f32.mrf.mxu1 }
  0xe2   : > { %v2443_v22 = vpop.f32.mrf.mxu0  ;;  %v2445_v23 = vpop.f32.mrf.mxu1 }
  0xe3   : > { %v591_v51 = vmax.f32 %v2441_v21, %v2445_v23  ;;  %v561_v4 = vmax.f32 %v2439_v20, %v2443_v22 }
  0xe4   : > { %v2447_v24 = vpop.f32.mrf.mxu0  ;;  %v2449_v25 = vpop.f32.mrf.mxu1 }
  0xe6   : > { %v2451_v26 = vpop.f32.mrf.mxu0  ;;  %v2453_v27 = vpop.f32.mrf.mxu1 }
  0xe7   : > { %v594_v42 = vmax.f32 %v2449_v25, %v2453_v27  ;;  %v564_v6 = vmax.f32 %v2447_v24, %v2451_v26 }
  0xe8   : > { %v2455_v28 = vpop.f32.mrf.mxu0  ;;  %v2457_v29 = vpop.f32.mrf.mxu1 }
  0xea   : > { %v2459_v30 = vpop.f32.mrf.mxu0  ;;  %v2461_v31 = vpop.f32.mrf.mxu1 }
  0xeb   : > { %v597_v32 = vmax.f32 %v2457_v29, %v2461_v31  ;;  %v567_v2 = vmax.f32 %v2455_v28, %v2459_v30 }
  0xec   : > { %v2465_v33 = vpop.f32.mrf.mxu0  ;;  %v2467_v34 = vpop.f32.mrf.mxu1 }
  0xed   : > { %598 = vmax.xlane.f32.xlu1 %v597_v32 }
  0xee   : > { %v2469_v35 = vpop.f32.mrf.mxu0  ;;  %v2471_v36 = vpop.f32.mrf.mxu1 }
  0xef   : > { %v600_v37 = vmax.f32 %v2467_v34, %v2471_v36  ;;  %v570_v5 = vmax.f32 %v2465_v33, %v2469_v35 }
  0xf0   : > { %v2475_v38 = vpop.f32.mrf.mxu0  ;;  %v2477_v39 = vpop.f32.mrf.mxu1 }
  0xf1   : > { %601 = vmax.xlane.f32.xlu1 %v600_v37 }
  0xf2   : > { %v2479_v40 = vpop.f32.mrf.mxu0  ;;  %v2481_v41 = vpop.f32.mrf.mxu1 }
  0xf3   : > { %v603_v43 = vmax.f32 %v2477_v39, %v2481_v41  ;;  %v573_v63 = vmax.f32 %v2475_v38, %v2479_v40 }
  0xf4   : > { %v2487_v44 = vpop.f32.mrf.mxu0  ;;  %v2489_v45 = vpop.f32.mrf.mxu1 }
  0xf5   : > { %595 = vmax.xlane.f32.xlu1 %v594_v42  ;;  %604 = vmax.xlane.f32.xlu0 %v603_v43 }
  0xf6   : > { %v2491_v46 = vpop.f32.mrf.mxu0  ;;  %v2493_v47 = vpop.f32.mrf.mxu1 }
  0xf7   : > { %v606_v48 = vmax.f32 %v2489_v45, %v2493_v47  ;;  %v576_v3 = vmax.f32 %v2487_v44, %v2491_v46 }
  0xf8   : > { %v2497_v49 = vpop.f32.mrf.mxu0 }
  0xf9   : > { %607 = vmax.xlane.f32.xlu0 %v606_v48 }
  0xfa   : > { %v2499_v50 = vpop.f32.mrf.mxu0 }
  0xfb   : > { %v579_v61 = vmax.f32 %v2497_v49, %v2499_v50 }
  0xfc   : > { %v2506_v53 = vpop.f32.mrf.mxu0 }
  0xfd   : > { %592 = vmax.xlane.f32.xlu0 %v591_v51 }
  0xfe   : > { %v2509_v54 = vpop.f32.mrf.mxu0 }
  0xff   : > { %v582_v1 = vmax.f32 %v2506_v53, %v2509_v54 }
 0x100   : > { %v2512_v55 = vpop.f32.mrf.mxu0 }
 0x102   : > { %v2514_v56 = vpop.f32.mrf.mxu0 }
 0x103   : > { %v585_v57 = vmax.f32 %v2512_v55, %v2514_v56 }
 0x104   : > { %v2518_v58 = vpop.f32.mrf.mxu0 }
 0x105   : > { %586 = vmax.xlane.f32.xlu0 %v585_v57 }
 0x106   : > { %v2523_v60 = vpop.f32.mrf.mxu0 }
 0x107   : > { %v588_v62 = vmax.f32 %v2518_v58, %v2523_v60 }
 0x108   : > { %v1108_v15 = vpop.f32.mrf.mxu0 }
 0x109   : > { %580 = vmax.xlane.f32.xlu0 %v579_v61  ;;  %589 = vmax.xlane.f32.xlu1 %v588_v62 }
 0x10a   : > { %v1110_v16 = vpop.f32.mrf.mxu0 }
 0x10c   : > { %v1112_v17 = vpop.f32.mrf.mxu0 }
 0x10d   : > { %574 = vmax.xlane.f32.xlu0 %v573_v63  ;;  %583 = vmax.xlane.f32.xlu1 %v582_v1  ;;  %v1187_v18 = vmax.f32 %v1108_v15, %v1112_v17 }
 0x10e   : > { %v2584_v19 = vpop.f32.mrf.mxu0 }
 0x10f   : > { %v1196_v32 = vmax.f32 %v1110_v16, %v2584_v19 }
 0x110   : > { %v1118_v37 = vpop.f32.mrf.mxu0 }
 0x111   : > { %568 = vmax.xlane.f32.xlu0 %v567_v2  ;;  %577 = vmax.xlane.f32.xlu1 %v576_v3  ;;  %v1188_v42 = vmax.f32 %v1187_v18, %v1118_v37 }
 0x112   : > { %v2587_v43 = vpop.f32.mrf.mxu0 }
 0x113   : > { %v1197_v48 = vmax.f32 %v1196_v32, %v2587_v43 }
 0x114   : > { %v1122_v51 = vpop.f32.mrf.mxu0 }
 0x115   : > { %562 = vmax.xlane.f32.xlu0 %v561_v4  ;;  %571 = vmax.xlane.f32.xlu1 %v570_v5  ;;  %v1189_v52 = vmax.f32 %v1188_v42, %v1122_v51 }
 0x116   : > { %v2590_v57 = vpop.f32.mrf.mxu0 }
 0x117   : > { %v1190_v59 = vrot.slane %v1189_v52, 4  ;;  %v1198_v61 = vmax.f32 %v1197_v48, %v2590_v57 }
 0x119   : > { %565 = vmax.xlane.f32.xlu1 %v564_v6  ;;  %v1191_v62 = vmax.f32 %v1189_v52, %v1190_v59  ;;  %v1199_v63 = vrot.slane %v1198_v61, 4 }
 0x11b   : > { %v1192_v1 = vrot.slane %v1191_v62, 2  ;;  %v1200_v2 = vmax.f32 %v1198_v61, %v1199_v63 }
 0x11d   : > { %v1193_v3 = vmax.f32 %v1191_v62, %v1192_v1  ;;  %v1201_v4 = vrot.slane %v1200_v2, 2 }
 0x11f   : > { %v1194_v5 = vrot.slane %v1193_v3, 1  ;;  %v1202_v6 = vmax.f32 %v1200_v2, %v1201_v4 }
 0x121   : > { %v1195_v7 = vmax.f32 %v1193_v3, %v1194_v5  ;;  %v1203_v8 = vrot.slane %v1202_v6, 1 }
 0x123   : > { %v1259_v10 = vsub.f32 %v1108_v15, %v1195_v7  ;;  %v1261_v11 = vsub.f32 %v1112_v17, %v1195_v7  ;;  %v1263_v12 = vsub.f32 %v1118_v37, %v1195_v7  ;;  %v1265_v13 = vsub.f32 %v1122_v51, %v1195_v7 }
 0x124   : > { %v1204_v32 = vmax.f32 %v1202_v6, %v1203_v8 }
 0x125   : > { %v1291_v42 = vmul.f32 1.442695, %v1259_v10  ;;  %v1295_v52 = vmul.f32 1.442695, %v1261_v11  ;;  %v1299_v62 = vmul.f32 1.442695, %v1263_v12 }
 0x126   : > { %v1260_v59 = vsub.f32 %v1110_v16, %v1204_v32  ;;  %v1262_v63 = vsub.f32 %v2584_v19, %v1204_v32  ;;  %v1264_v1 = vsub.f32 %v2587_v43, %v1204_v32  ;;  %v1266_v15 = vsub.f32 %v2590_v57, %v1204_v32 }
 0x127   : > { %2023 = vpow2.f32 %v1291_v42  ;;  %v1303_v51 = vmul.f32 1.442695, %v1265_v13 }
 0x128   : > { %v1293_v57 = vmul.f32 1.442695, %v1260_v59  ;;  %v1301_v11 = vmul.f32 1.442695, %v1264_v1  ;;  %v1305_v42 = vmul.f32 1.442695, %v1266_v15 }
 0x176   : > { %v599_v9 = vpop.xlane.xlu1 %598 }
 0x177   : > { %v633_v14 = vsub.f32 %v2457_v29, %v599_v9  ;;  %v634_v18 = vsub.f32 %v2461_v31, %v599_v9  ;;  %v1297_v9 = vmul.f32 1.442695, %v1262_v63 }
 0x179   : > { %v689_v48 = vmul.f32 1.442695, %v633_v14  ;;  %v691_v17 = vmul.f32 1.442695, %v634_v18  ;;  %v2608_v14 = vpop.eup %2023 }
 0x17a   : > { %v602_v61 = vpop.xlane.xlu1 %601 }
 0x17b   : > { %v635_v37 = vsub.f32 %v2467_v34, %v602_v61  ;;  %v636_v29 = vsub.f32 %v2471_v36, %v602_v61  ;;  %2025 = vpow2.f32 %v689_v48 }
 0x17c   : > { %2027 = vpow2.f32 %v1295_v52 }
 0x17d   : > { %v693_v31 = vmul.f32 1.442695, %v635_v37  ;;  %v695_v2 = vmul.f32 1.442695, %v636_v29  ;;  %2029 = vpow2.f32 %v1299_v62 }
 0x17e   : > { %v596_v16 = vpop.xlane.xlu1 %595  ;;  %v605_v3 = vpop.xlane.xlu0 %604  ;;  %2031 = vpow2.f32 %v691_v17 }
 0x17f   : > { %v631_v19 = vsub.f32 %v2449_v25, %v596_v16  ;;  %v637_v43 = vsub.f32 %v2477_v39, %v605_v3  ;;  %2033 = vpow2.f32 %v693_v31  ;;  %v638_v34 = vsub.f32 %v2481_v41, %v605_v3 }
 0x180   : > { %2035 = vpow2.f32 %v1303_v51  ;;  %v632_v25 = vsub.f32 %v2453_v27, %v596_v16 }
 0x181   : > { %v685_v4 = vmul.f32 1.442695, %v631_v19  ;;  %v697_v36 = vmul.f32 1.442695, %v637_v43  ;;  %2037 = vpow2.f32 %v695_v2  ;;  %v699_v5 = vmul.f32 1.442695, %v638_v34 }
 0x182   : > { %v608_v6 = vpop.xlane.xlu0 %607  ;;  %2039 = vpow2.f32 %v1293_v57 }
 0x183   : > { %v639_v7 = vsub.f32 %v2489_v45, %v608_v6  ;;  %v640_v8 = vsub.f32 %v2493_v47, %v608_v6  ;;  %2041 = vpow2.f32 %v685_v4  ;;  %v687_v47 = vmul.f32 1.442695, %v632_v25 }
 0x184   : > { %2043 = vpow2.f32 %v697_v36 }
 0x185   : > { %v701_v39 = vmul.f32 1.442695, %v639_v7  ;;  %v703_v10 = vmul.f32 1.442695, %v640_v8  ;;  %2045 = vpow2.f32 %v699_v5 }
 0x186   : > { %v593_v41 = vpop.xlane.xlu0 %592 }
 0x187   : > { %2047 = vpow2.f32 %v701_v39  ;;  %v629_v12 = vsub.f32 %v2441_v21, %v593_v41  ;;  %v630_v13 = vsub.f32 %v2445_v23, %v593_v41 }
 0x188   : > { %2049 = vpow2.f32 %v703_v10  ;;  %v2610_v45 = vpop.eup %2025 }
 0x189   : > { %3159 = vst [vmem:[#allocation5_spill] sm:$0xff] %v2610_v45  ;;  %v681_v18 = vmul.f32 1.442695, %v629_v12  ;;  %v683_v32 = vmul.f32 1.442695, %v630_v13  ;;  %2051 = vpow2.f32 %v1297_v9  ;;  %v2612_v27 = vpop.eup %2027 }
 0x18a   : > { %2053 = vpow2.f32 %v1301_v11  ;;  %v2614_v48 = vpop.eup %2029  ;;  %v1355_v21 = vadd.f32 %v2612_v27, %v2608_v14 }
 0x18b   : > { %2055 = vpow2.f32 %v681_v18  ;;  %v2618_v23 = vpop.eup %2031 }
 0x18c   : > { %3160 = vst [vmem:[#allocation6_spill] sm:$0xff] %v2618_v23  ;;  %2057 = vpow2.f32 %v683_v32  ;;  %v2620_v52 = vpop.eup %2033  ;;  %v1356_v59 = vadd.f32 %v2614_v48, %v1355_v21  ;;  %v741_v12 = vadd.f32 %v2618_v23, %v2610_v45 }
 0x18d   : > { %3161 = vst [vmem:[#allocation7_spill] sm:$0xff] %v2620_v52  ;;  %2059 = vpow2.f32 %v687_v47  ;;  %v2623_v61 = vpop.eup %2035 }
 0x18e   : > { %v587_v62 = vpop.xlane.xlu0 %586  ;;  %2061 = vpow2.f32 %v1305_v42  ;;  %v2625_v63 = vpop.eup %2037  ;;  %v2630_v17 = vadd.f32 %v2623_v61, %v1356_v59 }
 0x18f   : > { %3162 = vst [vmem:[#allocation8_spill] sm:$0xff] %v2625_v63  ;;  %v625_v1 = vsub.f32 %v2512_v55, %v587_v62  ;;  %v626_v15 = vsub.f32 %v2514_v56, %v587_v62  ;;  %v2632_v37 = vpop.eup %2039  ;;  %v744_v59 = vadd.f32 %v2625_v63, %v2620_v52 }
 0x190   : > { %v2634_v29 = vpop.eup %2041 }
 0x191   : > { %3163 = vst [vmem:[#allocation9_spill] sm:$0xff] %v2634_v29  ;;  %v673_v31 = vmul.f32 1.442695, %v625_v1  ;;  %v675_v51 = vmul.f32 1.442695, %v626_v15  ;;  %v2636_v2 = vpop.eup %2043 }
 0x192   : > { %v581_v16 = vpop.xlane.xlu0 %580  ;;  %v590_v3 = vpop.xlane.xlu1 %589 }
 0x193   : > { %v2638_v19 = vpop.eup %2045  ;;  %2063 = vpow2.f32 %v673_v31  ;;  %v621_v55 = vsub.f32 %v2497_v49, %v581_v16  ;;  %v622_v56 = vsub.f32 %v2499_v50, %v581_v16  ;;  %v627_v43 = vsub.f32 %v2518_v58, %v590_v3 }
 0x194   : > { %v2643_v57 = vpop.eup %2047  ;;  %2065 = vpow2.f32 %v675_v51  ;;  %v628_v34 = vsub.f32 %v2523_v60, %v590_v3  ;;  %v747_v4 = vadd.f32 %v2638_v19, %v2636_v2 }
 0x195   : > { %v2648_v36 = vpop.eup %2049  ;;  %v665_v5 = vmul.f32 1.442695, %v621_v55  ;;  %v667_v6 = vmul.f32 1.442695, %v622_v56  ;;  %v677_v7 = vmul.f32 1.442695, %v627_v43 }
 0x196   : > { %v2650_v8 = vpop.eup %2051  ;;  %v679_v49 = vmul.f32 1.442695, %v628_v34  ;;  %748 = vadd.xlane.f32.xlu0 %v747_v4  ;;  %v575_v50 = vpop.xlane.xlu0 %574  ;;  %v750_v58 = vadd.f32 %v2648_v36, %v2643_v57 }
 0x197   : > { %v584_v9 = vpop.xlane.xlu1 %583  ;;  %v2654_v25 = vpop.eup %2053  ;;  %2067 = vpow2.f32 %v665_v5  ;;  %v617_v60 = vsub.f32 %v2475_v38, %v575_v50  ;;  %v618_v39 = vsub.f32 %v2479_v40, %v575_v50  ;;  %v1364_v13 = vadd.f32 %v2650_v8, %v2632_v37 }
 0x198   : > { %v623_v10 = vsub.f32 %v2506_v53, %v584_v9  ;;  %v2659_v41 = vpop.eup %2055  ;;  %2069 = vpow2.f32 %v667_v6  ;;  %v624_v11 = vsub.f32 %v2509_v54, %v584_v9  ;;  %751 = vadd.xlane.f32.xlu1 %v750_v58  ;;  %v2689_v6 = vpop.f32.mrf.mxu0 }
 0x199   : > { %3164 = vst [vmem:[#allocation10_spill] sm:$0xff] %v2659_v41  ;;  %v2666_v47 = vpop.eup %2057  ;;  %2071 = vpow2.f32 %v677_v7  ;;  %v657_v38 = vmul.f32 1.442695, %v617_v60  ;;  %v659_v18 = vmul.f32 1.442695, %v618_v39  ;;  %v1365_v16 = vadd.f32 %v2654_v25, %v1364_v13 }
 0x19a   : > { %3165 = vst [vmem:[#allocation11_spill] sm:$0xff] %v2666_v47  ;;  %v669_v40 = vmul.f32 1.442695, %v623_v10  ;;  %v2668_v32 = vpop.eup %2059  ;;  %2073 = vpow2.f32 %v679_v49  ;;  %v671_v53 = vmul.f32 1.442695, %v624_v11  ;;  %742 = vadd.xlane.f32.xlu0 %v741_v12  ;;  %v569_v42 = vpop.xlane.xlu0 %568  ;;  %v735_v21 = vadd.f32 %v2666_v47, %v2659_v41 }
 0x19b   : > { %3166 = vst [vmem:[#allocation12_spill] sm:$0xff] %v2668_v32  ;;  %v578_v54 = vpop.xlane.xlu1 %577  ;;  %v2674_v62 = vpop.eup %2061  ;;  %2075 = vpow2.f32 %v657_v38  ;;  %v613_v1 = vsub.f32 %v2455_v28, %v569_v42  ;;  %v614_v15 = vsub.f32 %v2459_v30, %v569_v42  ;;  %v738_v28 = vadd.f32 %v2668_v32, %v2634_v29 }
 0x19c   : > { %v619_v31 = vsub.f32 %v2487_v44, %v578_v54  ;;  %2077 = vpow2.f32 %v659_v18  ;;  %v620_v51 = vsub.f32 %v2491_v46, %v578_v54  ;;  %745 = vadd.xlane.f32.xlu1 %v744_v59  ;;  %v2684_v30 = vadd.f32 %v2674_v62, %v1365_v16  ;;  %v2696_v39 = vpop.f32.mrf.mxu0 }
 0x19d   : > { %2079 = vpow2.f32 %v669_v40  ;;  %v649_v3 = vmul.f32 1.442695, %v613_v1  ;;  %v651_v55 = vmul.f32 1.442695, %v614_v15 }
 0x19e   : > { %v661_v56 = vmul.f32 1.442695, %v619_v31  ;;  %2081 = vpow2.f32 %v671_v53  ;;  %v663_v43 = vmul.f32 1.442695, %v620_v51  ;;  %736 = vadd.xlane.f32.xlu0 %v735_v21  ;;  %v563_v34 = vpop.xlane.xlu0 %562  ;;  %v2702_v11 = vpop.f32.mrf.mxu0 }
 0x19f   : > { %v572_v4 = vpop.xlane.xlu1 %571  ;;  %2083 = vpow2.f32 %v649_v3  ;;  %v609_v44 = vsub.f32 %v2439_v20, %v563_v34  ;;  %v610_v46 = vsub.f32 %v2443_v22, %v563_v34  ;;  %v1205_v13 = vmax.f32 %v2689_v6, %v2702_v11 }
 0x1a0   : > { %v615_v5 = vsub.f32 %v2465_v33, %v572_v4  ;;  %v2691_v7 = vpop.eup %2063  ;;  %2085 = vpow2.f32 %v651_v55  ;;  %v616_v49 = vsub.f32 %v2469_v35, %v572_v4  ;;  %739 = vadd.xlane.f32.xlu1 %v738_v28  ;;  %v2710_v53 = vpop.f32.mrf.mxu0 }
 0x1a1   : > { %3167 = vst [vmem:[#allocation13_spill] sm:$0xff] %v2691_v7  ;;  %v2694_v50 = vpop.eup %2065  ;;  %2087 = vpow2.f32 %v661_v56  ;;  %v641_v9 = vmul.f32 1.442695, %v609_v44  ;;  %v643_v58 = vmul.f32 1.442695, %v610_v46 }
 0x1a2   : > { %3168 = vst [vmem:[#allocation14_spill] sm:$0xff] %v2694_v50  ;;  %v653_v60 = vmul.f32 1.442695, %v615_v5  ;;  %2089 = vpow2.f32 %v663_v43  ;;  %v655_v20 = vmul.f32 1.442695, %v616_v49  ;;  %v729_v33 = vadd.f32 %v2694_v50, %v2691_v7  ;;  %v2720_v21 = vpop.f32.mrf.mxu0 }
 0x1a3   : > { %v566_v22 = vpop.xlane.xlu1 %565  ;;  %2091 = vpow2.f32 %v641_v9  ;;  %v1206_v15 = vmax.f32 %v1205_v13, %v2720_v21 }
 0x1a4   : > { %v611_v10 = vsub.f32 %v2447_v24, %v566_v22  ;;  %v612_v35 = vsub.f32 %v2451_v26, %v566_v22  ;;  %v2704_v12 = vpop.eup %2067  ;;  %2093 = vpow2.f32 %v643_v58  ;;  %730 = vadd.xlane.f32.xlu0 %v729_v33  ;;  %v1214_v26 = vmax.f32 %v2696_v39, %v2710_v53  ;;  %v2729_v51 = vpop.f32.mrf.mxu0 }
 0x1a5   : > { %3169 = vst [vmem:[#allocation15_spill] sm:$0xff] %v2704_v12  ;;  %v2708_v38 = vpop.eup %2069  ;;  %2095 = vpow2.f32 %v653_v60 }
 0x1a6   : > { %3170 = vst [vmem:[#allocation16_spill] sm:$0xff] %v2708_v38  ;;  %v645_v18 = vmul.f32 1.442695, %v611_v10  ;;  %v647_v40 = vmul.f32 1.442695, %v612_v35  ;;  %v2712_v42 = vpop.eup %2071  ;;  %2097 = vpow2.f32 %v655_v20  ;;  %v723_v24 = vadd.f32 %v2708_v38, %v2704_v12  ;;  %v1142_v43 = vpop.f32.mrf.mxu0 }
 0x1a7   : > { %3171 = vst [vmem:[#allocation17_spill] sm:$0xff] %v2712_v42  ;;  %v2718_v54 = vpop.eup %2073  ;;  %v1215_v55 = vmax.f32 %v1214_v26, %v2729_v51  ;;  %v1207_v28 = vmax.f32 %v1206_v15, %v1142_v43 }
 0x1a8   : > { %3172 = vst [vmem:[#allocation18_spill] sm:$0xff] %v2718_v54  ;;  %2099 = vpow2.f32 %v645_v18  ;;  %v2722_v59 = vpop.eup %2075  ;;  %724 = vadd.xlane.f32.xlu0 %v723_v24  ;;  %v732_v1 = vadd.f32 %v2718_v54, %v2712_v42  ;;  %v2744_v46 = vpop.f32.mrf.mxu0 }
 0x1a9   : > { %3173 = vst [vmem:[#allocation19_spill] sm:$0xff] %v2722_v59  ;;  %2101 = vpow2.f32 %v647_v40  ;;  %v2727_v31 = vpop.eup %2077  ;;  %v1208_v9 = vrot.slane %v1207_v28, 4  ;;  %v1216_v58 = vmax.f32 %v1215_v55, %v2744_v46 }
 0x1aa   : > { %3174 = vst [vmem:[#allocation20_spill] sm:$0xff] %v2727_v31  ;;  %v2731_v16 = vpop.eup %2079  ;;  %733 = vadd.xlane.f32.xlu1 %v732_v1  ;;  %v717_v3 = vadd.f32 %v2727_v31, %v2722_v59  ;;  %v2753_v20 = vpop.f32.mrf.mxu0 }
 0x1ab   : > { %3175 = vst [vmem:[#allocation21_spill] sm:$0xff] %v2731_v16  ;;  %v2736_v56 = vpop.eup %2081  ;;  %v1209_v10 = vmax.f32 %v1207_v28, %v1208_v9  ;;  %v1217_v35 = vrot.slane %v1216_v58, 4 }
 0x1ac   : > { %3176 = vst [vmem:[#allocation22_spill] sm:$0xff] %v2736_v56  ;;  %v2738_v34 = vpop.eup %2083  ;;  %718 = vadd.xlane.f32.xlu0 %v717_v3  ;;  %v726_v4 = vadd.f32 %v2736_v56, %v2731_v16  ;;  %v2761_v18 = vpop.f32.mrf.mxu0 }
 0x1ad   : > { %3177 = vst [vmem:[#allocation23_spill] sm:$0xff] %v2738_v34  ;;  %v2742_v44 = vpop.eup %2085  ;;  %v1210_v26 = vrot.slane %v1209_v10, 2  ;;  %v1218_v1 = vmax.f32 %v1216_v58, %v1217_v35 }
 0x1ae   : > { %3178 = vst [vmem:[#allocation24_spill] sm:$0xff] %v2742_v44  ;;  %v2746_v5 = vpop.eup %2087  ;;  %727 = vadd.xlane.f32.xlu1 %v726_v4  ;;  %v711_v49 = vadd.f32 %v2742_v44, %v2738_v34  ;;  %v2769_v3 = vpop.f32.mrf.mxu0 }
 0x1af   : > { %3179 = vst [vmem:[#allocation25_spill] sm:$0xff] %v2746_v5  ;;  %v2751_v60 = vpop.eup %2089  ;;  %v1211_v28 = vmax.f32 %v1209_v10, %v1210_v26  ;;  %v1223_v9 = vmax.f32 %v2753_v20, %v2769_v3 }
 0x1b0   : > { %3180 = vst [vmem:[#allocation26_spill] sm:$0xff] %v2751_v60  ;;  %v2755_v22 = vpop.eup %2091  ;;  %712 = vadd.xlane.f32.xlu0 %v711_v49  ;;  %v720_v33 = vadd.f32 %v2751_v60, %v2746_v5  ;;  %v1219_v49 = vrot.slane %v1218_v1, 2  ;;  %v2779_v0 = vpop.f32.mrf.mxu0 }
 0x1b1   : > { %3181 = vst [vmem:[#allocation27_spill] sm:$0xff] %v2755_v22  ;;  %v2759_v13 = vpop.eup %2093  ;;  %v1212_v35 = vrot.slane %v1211_v28, 1 }
 0x1b2   : > { %3182 = vst [vmem:[#allocation28_spill] sm:$0xff] %v2759_v13  ;;  %v2763_v40 = vpop.eup %2095  ;;  %721 = vadd.xlane.f32.xlu1 %v720_v33  ;;  %v705_v24 = vadd.f32 %v2759_v13, %v2755_v22  ;;  %v1220_v22 = vmax.f32 %v1218_v1, %v1219_v49  ;;  %v2785_v13 = vpop.f32.mrf.mxu0 }
 0x1b3   : > { %3183 = vst [vmem:[#allocation29_spill] sm:$0xff] %v2763_v40  ;;  %v2767_v15 = vpop.eup %2097  ;;  %v1213_v10 = vmax.f32 %v1211_v28, %v1212_v35  ;;  %v1224_v34 = vmax.f32 %v1223_v9, %v2785_v13 }
 0x1b4   : > { %3184 = vst [vmem:[#allocation30_spill] sm:$0xff] %v2767_v15  ;;  %706 = vadd.xlane.f32.xlu0 %v705_v24  ;;  %v714_v4 = vadd.f32 %v2767_v15, %v2763_v40  ;;  %v1232_v24 = vmax.f32 %v2761_v18, %v2779_v0  ;;  %v1221_v26 = vrot.slane %v1220_v22, 1  ;;  %v2788_v40 = vpop.f32.mrf.mxu0 }
 0x1b5   : > { %v2771_v55 = vpop.eup %2099  ;;  %v1267_v44 = vsub.f32 %v2689_v6, %v1213_v10 }
 0x1b6   : > { %3185 = vst [vmem:[#allocation31_spill] sm:$0xff] %v2771_v55  ;;  %v2777_v33 = vpop.eup %2101  ;;  %715 = vadd.xlane.f32.xlu1 %v714_v4  ;;  %v1269_v4 = vsub.f32 %v2702_v11, %v1213_v10  ;;  %v1222_v1 = vmax.f32 %v1220_v22, %v1221_v26  ;;  %v1233_v49 = vmax.f32 %v1232_v24, %v2788_v40  ;;  %v2794_v59 = vpop.f32.mrf.mxu0 }
 0x1b7   : > { %3186 = vst [vmem:[#allocation32_spill] sm:$0xff] %v2777_v33  ;;  %v708_v58 = vadd.f32 %v2777_v33, %v2771_v55  ;;  %v1271_v55 = vsub.f32 %v2720_v21, %v1213_v10  ;;  %v1273_v33 = vsub.f32 %v1142_v43, %v1213_v10  ;;  %v1307_v15 = vmul.f32 1.442695, %v1267_v44 }
 0x1b8   : > { %v1311_v28 = vmul.f32 1.442695, %v1269_v4  ;;  %v1225_v9 = vmax.f32 %v1224_v34, %v2794_v59  ;;  %v1270_v6 = vsub.f32 %v2710_v53, %v1222_v1  ;;  %v1272_v11 = vsub.f32 %v2729_v51, %v1222_v1  ;;  %v2800_v31 = vpop.f32.mrf.mxu0 }
 0x1b9   : > { %v1315_v35 = vmul.f32 1.442695, %v1271_v55  ;;  %v1319_v5 = vmul.f32 1.442695, %v1273_v33  ;;  %2103 = vpow2.f32 %v1307_v15  ;;  %v1274_v21 = vsub.f32 %v2744_v46, %v1222_v1 }
 0x1ba   : > { %709 = vadd.xlane.f32.xlu1 %v708_v58  ;;  %v1268_v58 = vsub.f32 %v2696_v39, %v1222_v1  ;;  %v1226_v43 = vrot.slane %v1225_v9, 4  ;;  %v1234_v22 = vmax.f32 %v1233_v49, %v2800_v31  ;;  %2105 = vpow2.f32 %v1311_v28  ;;  %v2804_v24 = vpop.f32.mrf.mxu0 }
 0x1bb   : > { %v1313_v55 = vmul.f32 1.442695, %v1270_v6  ;;  %2107 = vpow2.f32 %v1315_v35  ;;  %v1317_v34 = vmul.f32 1.442695, %v1272_v11  ;;  %v1321_v53 = vmul.f32 1.442695, %v1274_v21 }
 0x1bc   : > { %v1309_v44 = vmul.f32 1.442695, %v1268_v58  ;;  %v1227_v39 = vmax.f32 %v1225_v9, %v1226_v43  ;;  %v1235_v33 = vrot.slane %v1234_v22, 4  ;;  %2109 = vpow2.f32 %v1319_v5  ;;  %v2806_v51 = vpop.f32.mrf.mxu0 }
 0x1be   : > { %2111 = vpow2.f32 %v1309_v44  ;;  %v1228_v15 = vrot.slane %v1227_v39, 2  ;;  %v1236_v10 = vmax.f32 %v1234_v22, %v1235_v33  ;;  %v2808_v46 = vpop.f32.mrf.mxu0 }
 0x1bf   : > { %2113 = vpow2.f32 %v1313_v55  ;;  %v1241_v1 = vmax.f32 %v2804_v24, %v2808_v46 }
 0x1c0   : > { %2115 = vpow2.f32 %v1317_v34  ;;  %v1229_v26 = vmax.f32 %v1227_v39, %v1228_v15  ;;  %v1237_v4 = vrot.slane %v1236_v10, 2  ;;  %v2812_v49 = vpop.f32.mrf.mxu0 }
 0x1c1   : > { %2117 = vpow2.f32 %v1321_v53  ;;  %v1250_v6 = vmax.f32 %v2806_v51, %v2812_v49 }
 0x1c2   : > { %v1230_v28 = vrot.slane %v1229_v26, 1  ;;  %v1238_v5 = vmax.f32 %v1236_v10, %v1237_v4  ;;  %v2814_v35 = vpop.f32.mrf.mxu0 }
 0x1c3   : > { %v1242_v9 = vmax.f32 %v1241_v1, %v2814_v35 }
 0x1c4   : > { %v1239_v58 = vrot.slane %v1238_v5, 1  ;;  %v2819_v11 = vpop.f32.mrf.mxu0  ;;  %v1231_v21 = vmax.f32 %v1229_v26, %v1230_v28 }
 0x1c5   : > { %v1251_v53 = vmax.f32 %v1250_v6, %v2819_v11 }
 0x1c6   : > { %v2821_v43 = vpop.eup %2103  ;;  %v1182_v22 = vpop.f32.mrf.mxu0  ;;  %v1240_v33 = vmax.f32 %v1238_v5, %v1239_v58  ;;  %v1275_v10 = vsub.f32 %v2753_v20, %v1231_v21  ;;  %v1279_v60 = vsub.f32 %v2785_v13, %v1231_v21 }
 0x1c7   : > { %v2823_v44 = vpop.eup %2105  ;;  %v1243_v55 = vmax.f32 %v1242_v9, %v1182_v22  ;;  %v1277_v9 = vsub.f32 %v2769_v3, %v1231_v21 }
 0x1c8   : > { %v2825_v34 = vpop.eup %2107  ;;  %v1373_v39 = vadd.f32 %v2823_v44, %v2821_v43  ;;  %v2833_v26 = vpop.f32.mrf.mxu0  ;;  %v1276_v16 = vsub.f32 %v2761_v18, %v1240_v33  ;;  %v1323_v3 = vmul.f32 1.442695, %v1275_v10  ;;  %v1331_v42 = vmul.f32 1.442695, %v1279_v60 }
 0x1c9   : > { %v2830_v15 = vpop.eup %2109  ;;  %v1244_v4 = vrot.slane %v1243_v55, 4  ;;  %v1252_v38 = vmax.f32 %v1251_v53, %v2833_v26  ;;  %v1327_v13 = vmul.f32 1.442695, %v1277_v9  ;;  %v1280_v18 = vsub.f32 %v2788_v40, %v1240_v33 }
 0x1ca   : > { %v1374_v28 = vadd.f32 %v2825_v34, %v1373_v39  ;;  %v1325_v53 = vmul.f32 1.442695, %v1276_v16  ;;  %2119 = vpow2.f32 %v1323_v3  ;;  %v1282_v47 = vsub.f32 %v2800_v31, %v1240_v33 }
 0x1cb   : > { %v2835_v1 = vpop.eup %2111  ;;  %v1245_v5 = vmax.f32 %v1243_v55, %v1244_v4  ;;  %v1278_v55 = vsub.f32 %v2779_v0, %v1240_v33  ;;  %v1253_v4 = vrot.slane %v1252_v38, 4  ;;  %2121 = vpow2.f32 %v1327_v13 }
 0x1cc   : > { %v2839_v12 = vpop.eup %2113  ;;  %v2845_v6 = vadd.f32 %v2830_v15, %v1374_v28  ;;  %v1281_v28 = vsub.f32 %v2794_v59, %v1231_v21  ;;  %2123 = vpow2.f32 %v1331_v42  ;;  %v1333_v59 = vmul.f32 1.442695, %v1280_v18 }
 0x1cd   : > { %v2842_v58 = vpop.eup %2115  ;;  %v1382_v20 = vadd.f32 %v2839_v12, %v2835_v1  ;;  %v1246_v7 = vrot.slane %v1245_v5, 2  ;;  %v1254_v41 = vmax.f32 %v1252_v38, %v1253_v4  ;;  %v1329_v29 = vmul.f32 1.442695, %v1278_v55 }
 0x1ce   : > { %v2851_v39 = vpop.eup %2117  ;;  %v1335_v9 = vmul.f32 1.442695, %v1281_v28  ;;  %2125 = vpow2.f32 %v1325_v53  ;;  %v1337_v31 = vmul.f32 1.442695, %v1282_v47 }
 0x1cf   : > { %v1383_v56 = vadd.f32 %v2842_v58, %v1382_v20  ;;  %v1247_v54 = vmax.f32 %v1245_v5, %v1246_v7  ;;  %v1255_v20 = vrot.slane %v1254_v41, 2  ;;  %2127 = vpow2.f32 %v1329_v29 }
 0x1d0   : > { %2129 = vpow2.f32 %v1335_v9 }
 0x1d1   : > { %v2857_v50 = vadd.f32 %v2851_v39, %v1383_v56  ;;  %v1248_v10 = vrot.slane %v1247_v54, 1  ;;  %v1256_v7 = vmax.f32 %v1254_v41, %v1255_v20  ;;  %2131 = vpow2.f32 %v1333_v59 }
 0x1d3   : > { %v1249_v0 = vmax.f32 %v1247_v54, %v1248_v10  ;;  %v1257_v40 = vrot.slane %v1256_v7, 1 }
 0x1d5   : > { %v1283_v56 = vsub.f32 %v2804_v24, %v1249_v0  ;;  %v1285_v60 = vsub.f32 %v2808_v46, %v1249_v0  ;;  %v1287_v16 = vsub.f32 %v2814_v35, %v1249_v0  ;;  %v1289_v38 = vsub.f32 %v1182_v22, %v1249_v0 }
 0x1d6   : > { %v1258_v3 = vmax.f32 %v1256_v7, %v1257_v40 }
 0x1d7   : > { %v1339_v21 = vmul.f32 1.442695, %v1283_v56  ;;  %v1343_v5 = vmul.f32 1.442695, %v1285_v60  ;;  %v1347_v42 = vmul.f32 1.442695, %v1287_v16  ;;  %v2868_v55 = vpop.eup %2119 }
 0x1d8   : > { %v1351_v54 = vmul.f32 1.442695, %v1289_v38  ;;  %v1284_v41 = vsub.f32 %v2806_v51, %v1258_v3  ;;  %v1286_v24 = vsub.f32 %v2812_v49, %v1258_v3  ;;  %v1288_v46 = vsub.f32 %v2819_v11, %v1258_v3  ;;  %v2870_v47 = vpop.eup %2121  ;;  %v2876_v11 = vpop.f32.mrf.mxu1 }
 0x1d9   : > { %2133 = vpow2.f32 %v1339_v21  ;;  %v1290_v29 = vsub.f32 %v2833_v26, %v1258_v3  ;;  %v2872_v51 = vpop.eup %2123  ;;  %3187 = vst [vmem:[#allocation33_spill] sm:$0xff] %v2876_v11  ;;  %v1391_v4 = vadd.f32 %v2870_v47, %v2868_v55  ;;  %v1376_v11 = vrot.slane %v2845_v6, 4 }
 0x1da   : > { %2135 = vpow2.f32 %v1343_v5  ;;  %v1341_v35 = vmul.f32 1.442695, %v1284_v41  ;;  %v1345_v22 = vmul.f32 1.442695, %v1286_v24  ;;  %v1349_v33 = vmul.f32 1.442695, %v1288_v46  ;;  %v917_v28 = vpop.f32.mrf.mxu1 }
 0x1db   : > { %2137 = vpow2.f32 %v1347_v42  ;;  %v1353_v13 = vmul.f32 1.442695, %v1290_v29  ;;  %v2874_v49 = vpop.eup %2125  ;;  %v1392_v7 = vadd.f32 %v2872_v51, %v1391_v4 }
 0x1dc   : > { %2139 = vpow2.f32 %v1351_v54  ;;  %v2878_v26 = vpop.eup %2127  ;;  %v2886_v10 = vpop.f32.mrf.mxu1 }
 0x1dd   : > { %2141 = vpow2.f32 %v1337_v31  ;;  %v2882_v18 = vpop.eup %2129  ;;  %3188 = vst [vmem:[#allocation34_spill] sm:$0xff] %v2886_v10  ;;  %v1400_v9 = vadd.f32 %v2878_v26, %v2874_v49 }
 0x1de   : > { %2143 = vpow2.f32 %v1341_v35  ;;  %v2884_v53 = vpop.eup %2131  ;;  %v921_v56 = vpop.f32.mrf.mxu1  ;;  %v1393_v3 = vadd.f32 %v2882_v18, %v1392_v7 }
 0x1df   : > { %2145 = vpow2.f32 %v1345_v22  ;;  %v995_v38 = vpack.c.bf16 %v921_v56, %v917_v28  ;;  %v1401_v5 = vadd.f32 %v2884_v53, %v1400_v9 }
 0x1e0   : > { %2147 = vpow2.f32 %v1349_v33  ;;  %v1394_v33 = vrot.slane %v1393_v3, 4 }
 0x1e1   : > { %2149 = vpow2.f32 %v1353_v13  ;;  %1523 = vmatprep.mubr.bf16.mxu1 %v995_v38 }
 0x1e2   : > { %v1395_v56 = vadd.f32 %v1394_v33, %v1393_v3 }
 0x1e4   : > { %v1396_v10 = vrot.slane %v1395_v56, 2 }
 0x1e6   : > { %v2888_v20 = vpop.eup %2133 }
 0x1e7   : > { %v2894_v59 = vpop.eup %2135 }
 0x1e8   : > { %v2897_v60 = vpop.eup %2137  ;;  %v1409_v16 = vadd.f32 %v2894_v59, %v2888_v20 }
 0x1e9   : > { %v2901_v40 = vpop.eup %2139 }
 0x1ea   : > { %v2903_v21 = vpop.eup %2141  ;;  %v1410_v42 = vadd.f32 %v2897_v60, %v1409_v16 }
 0x1eb   : > { %v2907_v54 = vpop.eup %2143  ;;  %v1402_v35 = vadd.f32 %v2903_v21, %v1401_v5  ;;  %v1385_v5 = vrot.slane %v2857_v50, 4 }
 0x1ec   : > { %v2910_v31 = vpop.eup %2145  ;;  %v1411_v41 = vadd.f32 %v2901_v40, %v1410_v42 }
 0x1ed   : > { %v2913_v24 = vpop.eup %2147  ;;  %v1418_v46 = vadd.f32 %v2910_v31, %v2907_v54  ;;  %v1403_v9 = vrot.slane %v1402_v35, 4  ;;  %v1386_v3 = vadd.f32 %v1385_v5, %v2857_v50 }
 0x1ee   : > { %v2150_v29 = vpop.eup %2149  ;;  %v1412_v22 = vrot.slane %v1411_v41, 4 }
 0x1ef   : > { %v1419_v13 = vadd.f32 %v2913_v24, %v1418_v46  ;;  %v1404_v0 = vadd.f32 %v1403_v9, %v1402_v35  ;;  %v1377_v46 = vadd.f32 %v1376_v11, %v2845_v6  ;;  %v1358_v35 = vrot.slane %v2630_v17, 4 }
 0x1f0   : > { %v1413_v4 = vadd.f32 %v1412_v22, %v1411_v41  ;;  %v1397_v41 = vadd.f32 %v1396_v10, %v1395_v56 }
 0x1f1   : > { %v1420_v28 = vadd.f32 %v2150_v29, %v1419_v13  ;;  %v1405_v63 = vrot.slane %v1404_v0, 2  ;;  %v1359_v6 = vadd.f32 %v1358_v35, %v2630_v17 }
 0x1f2   : > { %v1414_v7 = vrot.slane %v1413_v4, 2 }
 0x1f3   : > { %v1421_v16 = vrot.slane %v1420_v28, 4  ;;  %v1406_v33 = vadd.f32 %v1405_v63, %v1404_v0  ;;  %v1360_v63 = vrot.slane %v1359_v6, 2 }
 0x1f4   : > { %v1415_v38 = vadd.f32 %v1414_v7, %v1413_v4  ;;  %v1378_v4 = vrot.slane %v1377_v46, 2  ;;  %v1387_v7 = vrot.slane %v1386_v3, 2 }
 0x1f5   : > { %v1422_v42 = vadd.f32 %v1421_v16, %v1420_v28  ;;  %v1398_v28 = vrot.slane %v1397_v41, 1  ;;  %v1407_v9 = vrot.slane %v1406_v33, 1 }
 0x1f6   : > { %v1416_v45 = vrot.slane %v1415_v38, 1  ;;  %v1379_v11 = vadd.f32 %v1378_v4, %v1377_v46 }
 0x1f7   : > { %v1423_v32 = vrot.slane %v1422_v42, 2  ;;  %v1408_v16 = vadd.f32 %v1407_v9, %v1406_v33  ;;  %v1399_v10 = vadd.f32 %v1398_v28, %v1397_v41 }
 0x1f8   : > { %v1417_v13 = vadd.f32 %v1416_v45, %v1415_v38  ;;  %v1380_v50 = vrot.slane %v1379_v11, 1 }
 0x1f9   : > { %v1424_v52 = vadd.f32 %v1423_v32, %v1422_v42  ;;  %v1367_v32 = vrot.slane %v2684_v30, 4  ;;  %v1361_v42 = vadd.f32 %v1360_v63, %v1359_v6 }
 0x1fa   : > { %2151 = vrcp.f32 %v1417_v13 }
 0x1fb   : > { %v1425_v22 = vrot.slane %v1424_v52, 1  ;;  %v1368_v45 = vadd.f32 %v1367_v32, %v2684_v30  ;;  %v1362_v30 = vrot.slane %v1361_v42, 1 }
 0x1fd   : > { %v1426_v23 = vadd.f32 %v1425_v22, %v1424_v52  ;;  %v1388_v52 = vadd.f32 %v1387_v7, %v1386_v3  ;;  %v1369_v38 = vrot.slane %v1368_v45, 2  ;;  %v1381_v22 = vadd.f32 %v1380_v50, %v1379_v11 }
 0x1ff   : > { %2153 = vrcp.f32 %v1426_v23  ;;  %v1389_v0 = vrot.slane %v1388_v52, 1  ;;  %v1370_v41 = vadd.f32 %v1369_v38, %v1368_v45 }
 0x200   : > { %2155 = vrcp.f32 %v1408_v16 }
 0x201   : > { %2157 = vrcp.f32 %v1399_v10  ;;  %v1390_v23 = vadd.f32 %v1389_v0, %v1388_v52 }
 0x203   : > { %2159 = vrcp.f32 %v1390_v23 }
 0x204   : > { %2161 = vrcp.f32 %v1381_v22 }
 0x207   : > { %v2152_v56 = vpop.eup %2151 }
 0x208   : > { %v1441_v5 = vmul.f32 0.17677669, %v2152_v56 }
 0x20a   : > { %v1471_v17 = vmul.f32 %v2897_v60, %v1441_v5  ;;  %v1473_v46 = vmul.f32 %v2901_v40, %v1441_v5  ;;  %v1467_v32 = vmul.f32 %v2888_v20, %v1441_v5  ;;  %v1469_v6 = vmul.f32 %v2894_v59, %v1441_v5 }
 0x20b   : > { %v1371_v60 = vrot.slane %v1370_v41, 1 }
 0x20c   : > { %v2154_v13 = vpop.eup %2153  ;;  %v1489_v4 = vpack.c.bf16 %v1473_v46, %v1471_v17 }
 0x20d   : > { %v1442_v33 = vmul.f32 0.17677669, %v2154_v13  ;;  %v2156_v7 = vpop.eup %2155  ;;  %v1372_v52 = vadd.f32 %v1371_v60, %v1370_v41 }
 0x20e   : > { %v2158_v11 = vpop.eup %2157  ;;  %v1440_v10 = vmul.f32 0.17677669, %v2156_v7 }
 0x20f   : > { %v1472_v3 = vmul.f32 %v2913_v24, %v1442_v33  ;;  %v1474_v35 = vmul.f32 %v2150_v29, %v1442_v33  ;;  %v1468_v28 = vmul.f32 %v2907_v54, %v1442_v33  ;;  %v1470_v9 = vmul.f32 %v2910_v31, %v1442_v33 }
 0x210   : > { %v1439_v45 = vmul.f32 0.17677669, %v2158_v11  ;;  %v1363_v24 = vadd.f32 %v1362_v30, %v1361_v42  ;;  %v1487_v29 = vpack.c.bf16 %v1469_v6, %v1467_v32  ;;  %v1464_v54 = vmul.f32 %v2884_v53, %v1440_v10  ;;  %v2160_v23 = vpop.eup %2159 }
 0x211   : > { %v1490_v16 = vpack.c.bf16 %v1474_v35, %v1472_v3  ;;  %v1488_v40 = vpack.c.bf16 %v1470_v9, %v1468_v28  ;;  %v1466_v31 = vmul.f32 %v2903_v21, %v1440_v10  ;;  %2163 = vrcp.f32 %v1372_v52  ;;  %v2162_v21 = vpop.eup %2161 }
 0x212   : > { %v1463_v20 = vmul.f32 %v2872_v51, %v1439_v45  ;;  %v1465_v63 = vmul.f32 %v2882_v18, %v1439_v45  ;;  %2165 = vrcp.f32 %v1363_v24  ;;  %v1460_v0 = vmul.f32 %v2874_v49, %v1440_v10 }
 0x213   : > { %1612 = vmatprep.subr.bf16.mxu0 %v1490_v16  ;;  %v1486_v59 = vpack.c.bf16 %v1466_v31, %v1464_v54  ;;  %v1462_v56 = vmul.f32 %v2878_v26, %v1440_v10  ;;  %v1459_v38 = vmul.f32 %v2868_v55, %v1439_v45  ;;  %v1461_v53 = vmul.f32 %v2870_v47, %v1439_v45  ;;  %v2962_v31 = vpop.f32.mrf.mxu1 }
 0x214   : > { %1613 = vmatpush1.bf16.msra.mxu0 %v1489_v4  ;;  %v1485_v50 = vpack.c.bf16 %v1465_v63, %v1463_v20  ;;  %v1438_v5 = vmul.f32 0.17677669, %v2160_v23  ;;  %v1437_v18 = vmul.f32 0.17677669, %v2162_v21  ;;  %v3189_v63 = vld [vmem:[#allocation6_spill] sm:$0xff]  ;;  %v3191_v23 = vld [vmem:[#allocation7_spill] sm:$0xff] }
 0x215   : > { %1614 = vmatprep.subr.bf16.mxu0 %v1488_v40  ;;  %v1484_v51 = vpack.c.bf16 %v1462_v56, %v1460_v0  ;;  %v1483_v13 = vpack.c.bf16 %v1461_v53, %v1459_v38  ;;  %v3192_v21 = vld [vmem:[#allocation12_spill] sm:$0xff] }
 0x216   : > { %v1456_v33 = vmul.f32 %v2842_v58, %v1438_v5  ;;  %v1458_v49 = vmul.f32 %v2851_v39, %v1438_v5  ;;  %v1455_v55 = vmul.f32 %v2825_v34, %v1437_v18  ;;  %v1457_v26 = vmul.f32 %v2830_v15, %v1437_v18 }
 0x217   : > { %v1452_v30 = vmul.f32 %v2835_v1, %v1438_v5  ;;  %v1454_v3 = vmul.f32 %v2839_v12, %v1438_v5  ;;  %v1451_v58 = vmul.f32 %v2821_v43, %v1437_v18  ;;  %v1453_v39 = vmul.f32 %v2823_v44, %v1437_v18  ;;  %v3194_v18 = vld [vmem:[#allocation11_spill] sm:$0xff] }
 0x218   : > { %1615 = vmatpush1.bf16.msra.mxu0 %v1487_v29  ;;  %v1482_v17 = vpack.c.bf16 %v1458_v49, %v1456_v33  ;;  %v1481_v46 = vpack.c.bf16 %v1457_v26, %v1455_v55 }
 0x219   : > { %1616 = vmatprep.subr.bf16.mxu0 %v1486_v59  ;;  %v1480_v4 = vpack.c.bf16 %v1454_v3, %v1452_v30  ;;  %v1479_v28 = vpack.c.bf16 %v1453_v39, %v1451_v58  ;;  %v3190_v59 = vld [vmem:[#allocation8_spill] sm:$0xff]  ;;  %v3196_v3 = vld [vmem:[#allocation10_spill] sm:$0xff] }
 0x21a   : > { %v3197_v39 = vld [vmem:[#allocation14_spill] sm:$0xff] }
 0x21c   : > { %1617 = vmatpush1.bf16.msra.mxu0 %v1485_v50  ;;  %v2966_v50 = vpop.f32.mrf.mxu1 }
 0x21d   : > { %1618 = vmatprep.subr.bf16.mxu0 %v1484_v51  ;;  %v3193_v51 = vld [vmem:[#allocation5_spill] sm:$0xff] }
 0x21e   : > { %v2164_v35 = vpop.eup %2163 }
 0x21f   : > { %v749_v42 = vpop.xlane.xlu0 %748  ;;  %v2166_v15 = vpop.eup %2165  ;;  %v1436_v9 = vmul.f32 0.17677669, %v2164_v35 }
 0x220   : > { %2167 = vrcp.f32 %v749_v42  ;;  %1619 = vmatpush1.bf16.msra.mxu0 %v1483_v13  ;;  %v1435_v7 = vmul.f32 0.17677669, %v2166_v15  ;;  %v2972_v13 = vpop.f32.mrf.mxu1 }
 0x221   : > { %v752_v22 = vpop.xlane.xlu1 %751  ;;  %1620 = vmatprep.subr.bf16.mxu0 %v1482_v17  ;;  %v1448_v12 = vmul.f32 %v2654_v25, %v1436_v9  ;;  %v1450_v43 = vmul.f32 %v2674_v62, %v1436_v9  ;;  %v1444_v6 = vmul.f32 %v2632_v37, %v1436_v9  ;;  %v1446_v60 = vmul.f32 %v2650_v8, %v1436_v9 }
 0x222   : > { %2169 = vrcp.f32 %v752_v22  ;;  %v1447_v1 = vmul.f32 %v2614_v48, %v1435_v7  ;;  %v1449_v44 = vmul.f32 %v2623_v61, %v1435_v7  ;;  %v1443_v11 = vmul.f32 %v2608_v14, %v1435_v7  ;;  %v2974_v26 = vpop.f32.mrf.mxu1 }
 0x223   : > { %v743_v47 = vpop.xlane.xlu0 %742  ;;  %v1478_v16 = vpack.c.bf16 %v1450_v43, %v1448_v12  ;;  %v1445_v45 = vmul.f32 %v2612_v27, %v1435_v7  ;;  %v1476_v25 = vpack.c.bf16 %v1446_v60, %v1444_v6  ;;  %v3200_v6 = vld [vmem:[#allocation22_spill] sm:$0xff] }
 0x224   : > { %2171 = vrcp.f32 %v743_v47  ;;  %1621 = vmatpush1.bf16.msra.mxu0 %v1481_v46  ;;  %v1477_v10 = vpack.c.bf16 %v1449_v44, %v1447_v1  ;;  %v3195_v46 = vld [vmem:[#allocation9_spill] sm:$0xff]  ;;  %v2980_v15 = vpop.f32.mrf.mxu1 }
 0x225   : > { %v746_v41 = vpop.xlane.xlu1 %745  ;;  %1622 = vmatprep.subr.bf16.mxu0 %v1480_v4  ;;  %v1475_v24 = vpack.c.bf16 %v1445_v45, %v1443_v11  ;;  %v3199_v44 = vld [vmem:[#allocation17_spill] sm:$0xff] }
 0x226   : > { %2173 = vrcp.f32 %v746_v41  ;;  %v2982_v12 = vpop.f32.mrf.mxu1  ;;  %v3201_v11 = vld [vmem:[#allocation13_spill] sm:$0xff] }
 0x227   : > { %v737_v34 = vpop.xlane.xlu0 %736 }
 0x228   : > { %2175 = vrcp.f32 %v737_v34  ;;  %1623 = vmatpush1.bf16.msra.mxu0 %v1479_v28  ;;  %v3198_v34 = vld [vmem:[#allocation18_spill] sm:$0xff] }
 0x229   : > { %v740_v32 = vpop.xlane.xlu1 %739  ;;  %1624 = vmatprep.subr.bf16.mxu0 %v1478_v16 }
 0x22a   : > { %2177 = vrcp.f32 %v740_v32 }
 0x22c   : > { %1625 = vmatpush1.bf16.msra.mxu0 %v1477_v10  ;;  %v3202_v10 = vld [vmem:[#allocation16_spill] sm:$0xff] }
 0x22d   : > { %v2168_v40 = vpop.eup %2167  ;;  %v731_v62 = vpop.xlane.xlu0 %730  ;;  %1626 = vmatprep.subr.bf16.mxu0 %v1476_v25 }
 0x22e   : > { %v798_v48 = vmul.f32 %v2168_v40, %v2638_v19  ;;  %v797_v37 = vmul.f32 %v2168_v40, %v2636_v2  ;;  %2179 = vrcp.f32 %v731_v62  ;;  %v2988_v25 = vpop.f32.mrf.mxu1 }
 0x22f   : > { %v2170_v52 = vpop.eup %2169 }
 0x230   : > { %v800_v61 = vmul.f32 %v2170_v52, %v2648_v36  ;;  %v799_v8 = vmul.f32 %v2170_v52, %v2643_v57  ;;  %1627 = vmatpush1.bf16.msra.mxu0 %v1475_v24 }
 0x231   : > { %v2172_v29 = vpop.eup %2171  ;;  %v725_v56 = vpop.xlane.xlu0 %724 }
 0x232   : > { %v816_v14 = vpack.c.bf16 %v800_v61, %v798_v48  ;;  %v815_v54 = vpack.c.bf16 %v799_v8, %v797_v37  ;;  %v794_v19 = vmul.f32 %v2172_v29, %v3189_v63  ;;  %v793_v5 = vmul.f32 %v2172_v29, %v3193_v51  ;;  %v941_v61 = vpop.f32.mrf.mxu1  ;;  %v3203_v29 = vld [vmem:[#allocation21_spill] sm:$0xff]  ;;  %v3209_v51 = vld [vmem:[#allocation19_spill] sm:$0xff] }
 0x233   : > { %v2174_v27 = vpop.eup %2173  ;;  %v734_v20 = vpop.xlane.xlu1 %733 }
 0x234   : > { %2181 = vrcp.f32 %v734_v20  ;;  %1491 = vmatprep.subr.bf16.mxu1 %v816_v14  ;;  %v796_v36 = vmul.f32 %v2174_v27, %v3190_v59  ;;  %v795_v53 = vmul.f32 %v2174_v27, %v3191_v23  ;;  %v3205_v20 = vld [vmem:[#allocation15_spill] sm:$0xff]  ;;  %v3207_v23 = vld [vmem:[#allocation25_spill] sm:$0xff] }
 0x235   : > { %1492 = vmatpush1.bf16.xpose.msra.mxu1 %v815_v54  ;;  %v2176_v2 = vpop.eup %2175  ;;  %v719_v17 = vpop.xlane.xlu0 %718  ;;  %v3204_v54 = vld [vmem:[#allocation26_spill] sm:$0xff] }
 0x236   : > { %v814_v57 = vpack.c.bf16 %v796_v36, %v794_v19  ;;  %v790_v22 = vmul.f32 %v2176_v2, %v3194_v18  ;;  %v813_v33 = vpack.c.bf16 %v795_v53, %v793_v5  ;;  %v789_v58 = vmul.f32 %v2176_v2, %v3196_v3  ;;  %v3206_v19 = vld [vmem:[#allocation20_spill] sm:$0xff]  ;;  %v945_v36 = vpop.f32.mrf.mxu1 }
 0x237   : > { %v2178_v0 = vpop.eup %2177  ;;  %v728_v38 = vpop.xlane.xlu1 %727  ;;  %v3210_v18 = vld [vmem:[#allocation24_spill] sm:$0xff] }
 0x238   : > { %2183 = vrcp.f32 %v728_v38  ;;  %1493 = vmatprep.subr.bf16.mxu1 %v814_v57  ;;  %v792_v42 = vmul.f32 %v2178_v0, %v3192_v21  ;;  %v791_v41 = vmul.f32 %v2178_v0, %v3195_v46  ;;  %v3208_v21 = vld [vmem:[#allocation30_spill] sm:$0xff]  ;;  %v3212_v3 = vld [vmem:[#allocation32_spill] sm:$0xff] }
 0x239   : > { %2185 = vrcp.f32 %v725_v56  ;;  %v713_v1 = vpop.xlane.xlu0 %712  ;;  %v947_v56 = vpop.f32.mrf.mxu1 }
 0x23a   : > { %v812_v49 = vpack.c.bf16 %v792_v42, %v790_v22  ;;  %v811_v28 = vpack.c.bf16 %v791_v41, %v789_v58  ;;  %v3211_v41 = vld [vmem:[#allocation29_spill] sm:$0xff] }
 0x23b   : > { %v722_v55 = vpop.xlane.xlu1 %721  ;;  %v2180_v47 = vpop.eup %2179 }
 0x23c   : > { %2187 = vrcp.f32 %v722_v55  ;;  %v786_v35 = vmul.f32 %v2180_v47, %v3197_v39  ;;  %v785_v40 = vmul.f32 %v2180_v47, %v3201_v11  ;;  %v3213_v39 = vld [vmem:[#allocation23_spill] sm:$0xff] }
 0x23d   : > { %1494 = vmatpush1.bf16.xpose.msra.mxu1 %v813_v33  ;;  %2189 = vrcp.f32 %v719_v17  ;;  %v707_v8 = vpop.xlane.xlu0 %706  ;;  %v949_v33 = vpop.f32.mrf.mxu1 }
 0x23e   : > { %1495 = vmatprep.subr.bf16.mxu1 %v812_v49 }
 0x23f   : > { %v716_v7 = vpop.xlane.xlu1 %715  ;;  %v951_v17 = vpop.f32.mrf.mxu1 }
 0x240   : > { %2191 = vrcp.f32 %v716_v7 }
 0x241   : > { %v2182_v30 = vpop.eup %2181  ;;  %2193 = vrcp.f32 %v713_v1 }
 0x242   : > { %v788_v4 = vmul.f32 %v2182_v30, %v3198_v34  ;;  %v787_v16 = vmul.f32 %v2182_v30, %v3199_v44  ;;  %v3214_v34 = vld [vmem:[#allocation28_spill] sm:$0xff]  ;;  %v3216_v44 = vld [vmem:[#allocation27_spill] sm:$0xff] }
 0x243   : > { %v710_v48 = vpop.xlane.xlu1 %709 }
 0x244   : > { %v810_v9 = vpack.c.bf16 %v788_v4, %v786_v35  ;;  %v809_v52 = vpack.c.bf16 %v787_v16, %v785_v40  ;;  %2195 = vrcp.f32 %v710_v48  ;;  %v997_v40 = vpack.c.bf16 %v2974_v26, %v2966_v50 }
 0x245   : > { %v2184_v32 = vpop.eup %2183  ;;  %1496 = vmatpush1.bf16.xpose.msra.mxu1 %v811_v28  ;;  %2197 = vrcp.f32 %v707_v8  ;;  %v955_v28 = vpop.f32.mrf.mxu1  ;;  %v999_v48 = vpack.c.bf16 %v941_v61, %v2982_v12  ;;  %v998_v50 = vpack.c.bf16 %v2988_v25, %v2980_v15 }
 0x246   : > { %1497 = vmatprep.subr.bf16.mxu1 %v810_v9  ;;  %v2186_v43 = vpop.eup %2185  ;;  %v784_v60 = vmul.f32 %v2184_v32, %v3200_v6  ;;  %v783_v14 = vmul.f32 %v2184_v32, %v3203_v29 }
 0x247   : > { %v782_v45 = vmul.f32 %v2186_v43, %v3202_v10  ;;  %v781_v63 = vmul.f32 %v2186_v43, %v3205_v20  ;;  %v957_v7 = vpop.f32.mrf.mxu1  ;;  %v3215_v43 = vld [vmem:[#allocation31_spill] sm:$0xff]  ;;  %v1000_v20 = vpack.c.bf16 %v949_v33, %v945_v36 }
 0x249   : > { %v808_v62 = vpack.c.bf16 %v784_v60, %v782_v45  ;;  %v2188_v24 = vpop.eup %2187  ;;  %v807_v2 = vpack.c.bf16 %v783_v14, %v781_v63  ;;  %v959_v6 = vpop.f32.mrf.mxu1  ;;  %v3217_v45 = vld [vmem:[#allocation34_spill] sm:$0xff]  ;;  %v1001_v14 = vpack.c.bf16 %v951_v17, %v947_v56  ;;  %v3220_v56 = vmov 0  }
 0x24a   : > { %v2190_v37 = vpop.eup %2189  ;;  %v780_v27 = vmul.f32 %v2188_v24, %v3204_v54  ;;  %v779_v53 = vmul.f32 %v2188_v24, %v3207_v23  ;;  %v305_v23 = vld [vmem:[%s3117_s1] sm:$0xff] }
 0x24b   : > { %v778_v59 = vmul.f32 %v2190_v37, %v3206_v19  ;;  %v777_v5 = vmul.f32 %v2190_v37, %v3209_v51  ;;  %v961_v11 = vpop.f32.mrf.mxu1  ;;  %v996_v37 = vpack.c.bf16 %v2972_v13, %v2962_v31  ;;  %v1002_v31 = vpack.c.bf16 %v959_v6, %v955_v28 }
 0x24d   : > { %1498 = vmatpush1.bf16.xpose.msra.mxu1 %v809_v52  ;;  %v806_v57 = vpack.c.bf16 %v780_v27, %v778_v59  ;;  %v2192_v0 = vpop.eup %2191  ;;  %v805_v49 = vpack.c.bf16 %v779_v53, %v777_v5  ;;  %v965_v10 = vpop.f32.mrf.mxu1  ;;  %v3218_v52 = vld [vmem:[#allocation33_spill] sm:$0xff]  ;;  %v1003_v27 = vpack.c.bf16 %v961_v11, %v957_v7 }
 0x24e   : > { %1499 = vmatprep.subr.bf16.mxu1 %v808_v62  ;;  %v2194_v38 = vpop.eup %2193  ;;  %v776_v42 = vmul.f32 %v2192_v0, %v3208_v21  ;;  %v775_v30 = vmul.f32 %v2192_v0, %v3211_v41  ;;  %v3219_v62 = vpack.c.bf16 %v3217_v45, %v3218_v52  ;;  %v306_v21 = vld [vmem:[%s3117_s1 + $0x8] sm:$0xff]  ;;  %v313_v52 = vld [vmem:[%s3117_s1 + $0x40] sm:$0xff] }
 0x24f   : > { %v774_v22 = vmul.f32 %v2194_v38, %v3210_v18  ;;  %v773_v35 = vmul.f32 %v2194_v38, %v3213_v39  ;;  %v967_v24 = vpop.f32.mrf.mxu1  ;;  %v309_v39 = vld [vmem:[%s3117_s1 + $0x20] sm:$0xff] }
 0x251   : > { %v804_v55 = vpack.c.bf16 %v776_v42, %v774_v22  ;;  %v2196_v47 = vpop.eup %2195  ;;  %v803_v9 = vpack.c.bf16 %v775_v30, %v773_v35  ;;  %v969_v8 = vpop.f32.mrf.mxu1 }
 0x252   : > { %v2198_v46 = vpop.eup %2197  ;;  %v772_v58 = vmul.f32 %v2196_v47, %v3212_v3  ;;  %v771_v1 = vmul.f32 %v2196_v47, %v3215_v43  ;;  %v308_v47 = vld [vmem:[%s3117_s1 + $0x18] sm:$0xff] }
 0x253   : > { %v770_v4 = vmul.f32 %v2198_v46, %v3214_v34  ;;  %v769_v16 = vmul.f32 %v2198_v46, %v3216_v44  ;;  %v971_v29 = vpop.f32.mrf.mxu1  ;;  %v310_v34 = vld [vmem:[%s3117_s1 + $0x28] sm:$0xff] }
 0x254   : > { %v1005_v61 = vpack.c.bf16 %v971_v29, %v967_v24  ;;  %v314_v24 = vld [vmem:[%s3117_s1 + $0x48] sm:$0xff] }
 0x255   : > { %1500 = vmatpush1.bf16.xpose.msra.mxu1 %v807_v2  ;;  %v802_v32 = vpack.c.bf16 %v772_v58, %v770_v4  ;;  %v801_v60 = vpack.c.bf16 %v771_v1, %v769_v16  ;;  %v975_v26 = vpop.f32.mrf.mxu1  ;;  %v1004_v2 = vpack.c.bf16 %v969_v8, %v965_v10  ;;  %v311_v1 = vld [vmem:[%s3117_s1 + $0x30] sm:$0xff]  ;;  %v312_v16 = vld [vmem:[%s3117_s1 + $0x38] sm:$0xff] }
 0x256   : > { %1501 = vmatprep.subr.bf16.mxu1 %v806_v57 }
 0x257   : > { %v977_v54 = vpop.f32.mrf.mxu1 }
 0x259   : > { %v979_v63 = vpop.f32.mrf.mxu1 }
 0x25a   : > { %v1006_v0 = vpack.c.bf16 %v979_v63, %v975_v26  ;;  %v315_v26 = vld [vmem:[%s3117_s1 + $0x50] sm:$0xff] }
 0x25b   : > { %v981_v12 = vpop.f32.mrf.mxu1 }
 0x25c   : > { %v1007_v59 = vpack.c.bf16 %v981_v12, %v977_v54 }
 0x25d   : > { %1502 = vmatpush1.bf16.xpose.msra.mxu1 %v805_v49  ;;  %v985_v13 = vpop.f32.mrf.mxu1  ;;  %v307_v49 = vld [vmem:[%s3117_s1 + $0x10] sm:$0xff] }
 0x25e   : > { %1503 = vmatprep.subr.bf16.mxu1 %v804_v55 }
 0x25f   : > { %v987_v19 = vpop.f32.mrf.mxu1 }
 0x261   : > { %v989_v57 = vpop.f32.mrf.mxu1 }
 0x262   : > { %v1008_v36 = vpack.c.bf16 %v989_v57, %v985_v13 }
 0x263   : > { %v991_v15 = vpop.f32.mrf.mxu1 }
 0x264   : > { %v1009_v25 = vpack.c.bf16 %v991_v15, %v987_v19  ;;  %v317_v19 = vld [vmem:[%s3117_s1 + $0x60] sm:$0xff] }
 0x265   : > { %1504 = vmatpush1.bf16.xpose.msra.mxu1 %v803_v9 }
 0x266   : > { %1505 = vmatprep.subr.bf16.mxu1 %v802_v32 }
 0x26d   : > { %1506 = vmatpush1.bf16.xpose.msra.mxu1 %v801_v60 }
 0x274   : > { %1524 = vmatmul.mubr.bf16.vlgmr.msra.gmra.mxu1 %v3219_v62 }
 0x275   : > { %1531 = vmatprep.mubr.bf16.mxu1 %v997_v40 }
 0x27c   : > { %1532 = vmatmul.mubr.bf16.gmra.mxu1 %v996_v37 }
 0x27d   : > { %1539 = vmatprep.mubr.bf16.mxu1 %v999_v48 }
 0x284   : > { %1540 = vmatmul.mubr.bf16.gmra.mxu1 %v998_v50 }
 0x285   : > { %1547 = vmatprep.mubr.bf16.mxu1 %v1001_v14 }
 0x28c   : > { %1548 = vmatmul.mubr.bf16.gmra.mxu1 %v1000_v20 }
 0x28d   : > { %1555 = vmatprep.mubr.bf16.mxu1 %v1003_v27  ;;  %v316_v27 = vld [vmem:[%s3117_s1 + $0x58] sm:$0xff] }
 0x294   : > { %1556 = vmatmul.mubr.bf16.gmra.mxu1 %v1002_v31 }
 0x295   : > { %1563 = vmatprep.mubr.bf16.mxu1 %v1005_v61 }
 0x29c   : > { %1564 = vmatmul.mubr.bf16.gmra.mxu1 %v1004_v2  ;;  %v318_v2 = vld [vmem:[%s3117_s1 + $0x68] sm:$0xff] }
 0x29d   : > { %1571 = vmatprep.mubr.bf16.mxu1 %v1007_v59 }
 0x2a4   : > { %1572 = vmatmul.mubr.bf16.gmra.mxu1 %v1006_v0 }
 0x2a5   : > { %1579 = vmatprep.mubr.bf16.mxu1 %v1009_v25 }
 0x2ac   : > { %1580 = vmatmul.mubr.bf16.gmra.mxu1 %v1008_v36 }
 0x2ad   : > { %1778 = vmatprep.mubr.bf16.mxu1 %v3220_v56 }
 0x334   : > { %v1525_v38 = vpop.f32.mrf.mxu1 }
 0x335   : > { %v1588_v51 = vmul.f32 %v1525_v38, %v305_v23  ;;  %v319_v23 = vld [vmem:[%s3117_s1 + $0x70] sm:$0xff] }
 0x336   : > { %v1527_v53 = vpop.f32.mrf.mxu1 }
 0x338   : > { %v1528_v42 = vpop.f32.mrf.mxu1 }
 0x339   : > { %v1589_v5 = vmul.f32 %v1528_v42, %v306_v21  ;;  %v320_v21 = vld [vmem:[%s3117_s1 + $0x78] sm:$0xff] }
 0x33a   : > { %v1530_v18 = vpop.f32.mrf.mxu1 }
 0x33b   : > { %v1604_v22 = vpack.c.bf16 %v1589_v5, %v1588_v51 }
 0x33c   : > { %v1533_v33 = vpop.f32.mrf.mxu1 }
 0x33d   : > { %1645 = vmatmul.mubr.bf16.vlgmr.msra.gmra.mxu0 %v1604_v22  ;;  %v1590_v46 = vmul.f32 %v1533_v33, %v307_v49  ;;  %v370_v33 = vld [vmem:[%s3122_s6] sm:$0xff] }
 0x33e   : > { %v1535_v55 = vpop.f32.mrf.mxu1  ;;  %1654 = vmatprep.mubr.bf16.mxu0 %v3220_v56  ;;  %v371_v49 = vld [vmem:[%s3123_s7] sm:$0xff]  ;;  %1743 = vperm.xlu0 %1997, %v370_v33  }
 0x33f   : > { %1809 = vperm.xlu1 %1998, %v371_v49  }
 0x340   : > { %v1536_v17 = vpop.f32.mrf.mxu1 }
 0x341   : > { %v1591_v41 = vmul.f32 %v1536_v17, %v308_v47 }
 0x342   : > { %v1538_v30 = vpop.f32.mrf.mxu1 }
 0x343   : > { %v1605_v3 = vpack.c.bf16 %v1591_v41, %v1590_v46 }
 0x344   : > { %v1541_v58 = vpop.f32.mrf.mxu1 }
 0x345   : > { %1655 = vmatmul.mubr.bf16.gmra.mxu0 %v1605_v3  ;;  %v1592_v28 = vmul.f32 %v1541_v58, %v309_v39 }
 0x346   : > { %v1543_v35 = vpop.f32.mrf.mxu1  ;;  %1664 = vmatprep.mubr.bf16.mxu0 %v3220_v56 }
 0x348   : > { %v1544_v4 = vpop.f32.mrf.mxu1 }
 0x349   : > { %v1593_v9 = vmul.f32 %v1544_v4, %v310_v34 }
 0x34a   : > { %v1546_v32 = vpop.f32.mrf.mxu1 }
 0x34b   : > { %v1606_v7 = vpack.c.bf16 %v1593_v9, %v1592_v28 }
 0x34c   : > { %v1549_v43 = vpop.f32.mrf.mxu1 }
 0x34d   : > { %1665 = vmatmul.mubr.bf16.gmra.mxu0 %v1606_v7  ;;  %v1594_v60 = vmul.f32 %v1549_v43, %v311_v1 }
 0x34e   : > { %v1551_v44 = vpop.f32.mrf.mxu1  ;;  %1674 = vmatprep.mubr.bf16.mxu0 %v3220_v56 }
 0x350   : > { %v1552_v6 = vpop.f32.mrf.mxu1 }
 0x351   : > { %v1595_v11 = vmul.f32 %v1552_v6, %v312_v16 }
 0x352   : > { %v1554_v40 = vpop.f32.mrf.mxu1 }
 0x353   : > { %v1607_v10 = vpack.c.bf16 %v1595_v11, %v1594_v60 }
 0x354   : > { %v1557_v45 = vpop.f32.mrf.mxu1 }
 0x355   : > { %1675 = vmatmul.mubr.bf16.gmra.mxu0 %v1607_v10  ;;  %v1596_v37 = vmul.f32 %v1557_v45, %v313_v52 }
 0x356   : > { %v1559_v62 = vpop.f32.mrf.mxu1  ;;  %1684 = vmatprep.mubr.bf16.mxu0 %v3220_v56 }
 0x358   : > { %v1560_v48 = vpop.f32.mrf.mxu1 }
 0x359   : > { %v1597_v8 = vmul.f32 %v1560_v48, %v314_v24 }
 0x35a   : > { %v1562_v29 = vpop.f32.mrf.mxu1 }
 0x35b   : > { %v1608_v14 = vpack.c.bf16 %v1597_v8, %v1596_v37 }
 0x35c   : > { %v1565_v50 = vpop.f32.mrf.mxu1 }
 0x35d   : > { %1685 = vmatmul.mubr.bf16.gmra.mxu0 %v1608_v14  ;;  %v1598_v63 = vmul.f32 %v1565_v50, %v315_v26 }
 0x35e   : > { %v1567_v54 = vpop.f32.mrf.mxu1  ;;  %1694 = vmatprep.mubr.bf16.mxu0 %v3220_v56 }
 0x360   : > { %v1568_v20 = vpop.f32.mrf.mxu1 }
 0x361   : > { %v1599_v12 = vmul.f32 %v1568_v20, %v316_v27 }
 0x362   : > { %v1570_v61 = vpop.f32.mrf.mxu1 }
 0x363   : > { %v1609_v31 = vpack.c.bf16 %v1599_v12, %v1598_v63 }
 0x364   : > { %v1573_v13 = vpop.f32.mrf.mxu1 }
 0x365   : > { %1695 = vmatmul.mubr.bf16.gmra.mxu0 %v1609_v31  ;;  %v1600_v15 = vmul.f32 %v1573_v13, %v317_v19 }
 0x366   : > { %v1575_v59 = vpop.f32.mrf.mxu1  ;;  %1704 = vmatprep.mubr.bf16.mxu0 %v3220_v56 }
 0x368   : > { %v1576_v57 = vpop.f32.mrf.mxu1 }
 0x369   : > { %v1601_v25 = vmul.f32 %v1576_v57, %v318_v2  ;;  %v369_v57 = vld [vmem:[%s3121_s5] sm:$0xf] }
 0x36a   : > { %v1578_v0 = vpop.f32.mrf.mxu1 }
 0x36b   : > { %v1610_v36 = vpack.c.bf16 %v1601_v25, %v1600_v15 }
 0x36c   : > { %v1581_v38 = vpop.f32.mrf.mxu1 }
 0x36d   : > { %1705 = vmatmul.mubr.bf16.gmra.mxu0 %v1610_v36  ;;  %v1602_v51 = vmul.f32 %v1581_v38, %v319_v23 }
 0x36e   : > { %v1583_v53 = vpop.f32.mrf.mxu1  ;;  %1714 = vmatprep.mubr.bf16.mxu0 %v3220_v56 }
 0x370   : > { %v1584_v42 = vpop.f32.mrf.mxu1 }
 0x371   : > { %v1603_v5 = vmul.f32 %v1584_v42, %v320_v21 }
 0x372   : > { %v1586_v18 = vpop.f32.mrf.mxu1 }
 0x373   : > { %v1611_v22 = vpack.c.bf16 %v1603_v5, %v1602_v51 }
 0x375   : > { %1715 = vmatmul.mubr.bf16.gmra.mxu0 %v1611_v22 }
 0x3b9   : > { %v1744_v15 = vpop.permute.xlu0 %1743 }
 0x3fd   : > { %v3076_v55 = vpop.f32.mrf.mxu0 }
 0x3ff   : > { %v1648_v47 = vpop.f32.mrf.mxu0 }
 0x401   : > { %v1650_v56 = vpop.f32.mrf.mxu0 }
 0x402   : > { %v1725_v17 = vpack.c.bf16 %v1650_v56, %v3076_v55 }
 0x403   : > { %v1652_v46 = vpop.f32.mrf.mxu0 }
 0x404   : > { %v1726_v41 = vpack.c.bf16 %v1652_v46, %v1648_v47 }
 0x405   : > { %v1656_v30 = vpop.f32.mrf.mxu0 }
 0x407   : > { %v1658_v3 = vpop.f32.mrf.mxu0 }
 0x409   : > { %v1660_v58 = vpop.f32.mrf.mxu0 }
 0x40a   : > { %v1727_v39 = vpack.c.bf16 %v1660_v58, %v1656_v30 }
 0x40b   : > { %v1662_v35 = vpop.f32.mrf.mxu0 }
 0x40c   : > { %v1728_v34 = vpack.c.bf16 %v1662_v35, %v1658_v3 }
 0x40d   : > { %v1666_v4 = vpop.f32.mrf.mxu0 }
 0x40f   : > { %v1668_v28 = vpop.f32.mrf.mxu0 }
 0x411   : > { %v1670_v9 = vpop.f32.mrf.mxu0 }
 0x412   : > { %v1729_v2 = vpack.c.bf16 %v1670_v9, %v1666_v4 }
 0x413   : > { %v1672_v32 = vpop.f32.mrf.mxu0 }
 0x414   : > { %v1730_v59 = vpack.c.bf16 %v1672_v32, %v1668_v28 }
 0x415   : > { %v1676_v7 = vpop.f32.mrf.mxu0 }
 0x417   : > { %v1678_v43 = vpop.f32.mrf.mxu0 }
 0x419   : > { %v1680_v1 = vpop.f32.mrf.mxu0 }
 0x41a   : > { %v1731_v19 = vpack.c.bf16 %v1680_v1, %v1676_v7 }
 0x41b   : > { %v1682_v44 = vpop.f32.mrf.mxu0 }
 0x41c   : > { %v1732_v13 = vpack.c.bf16 %v1682_v44, %v1678_v43 }
 0x41d   : > { %v1686_v16 = vpop.f32.mrf.mxu0 }
 0x41f   : > { %v1688_v6 = vpop.f32.mrf.mxu0 }
 0x421   : > { %v1690_v60 = vpop.f32.mrf.mxu0 }
 0x422   : > { %v1733_v31 = vpack.c.bf16 %v1690_v60, %v1686_v16 }
 0x423   : > { %v1692_v11 = vpop.f32.mrf.mxu0 }
 0x424   : > { %v1734_v61 = vpack.c.bf16 %v1692_v11, %v1688_v6 }
 0x425   : > { %v1696_v40 = vpop.f32.mrf.mxu0 }
 0x427   : > { %v1698_v10 = vpop.f32.mrf.mxu0 }
 0x429   : > { %v1700_v45 = vpop.f32.mrf.mxu0 }
 0x42a   : > { %v1735_v12 = vpack.c.bf16 %v1700_v45, %v1696_v40 }
 0x42b   : > { %v1702_v52 = vpop.f32.mrf.mxu0 }
 0x42c   : > { %v1736_v63 = vpack.c.bf16 %v1702_v52, %v1698_v10 }
 0x42d   : > { %v1706_v62 = vpop.f32.mrf.mxu0 }
 0x42f   : > { %v1708_v24 = vpop.f32.mrf.mxu0 }
 0x431   : > { %v1710_v48 = vpop.f32.mrf.mxu0 }
 0x432   : > { %v1737_v20 = vpack.c.bf16 %v1710_v48, %v1706_v62 }
 0x433   : > { %v1712_v37 = vpop.f32.mrf.mxu0 }
 0x434   : > { %v1738_v27 = vpack.c.bf16 %v1712_v37, %v1708_v24 }
 0x435   : > { %v1716_v8 = vpop.f32.mrf.mxu0 }
 0x437   : > { %v1718_v29 = vpop.f32.mrf.mxu0 }
 0x439   : > { %v1720_v14 = vpop.f32.mrf.mxu0 }
 0x43a   : > { %v1739_v54 = vpack.c.bf16 %v1720_v14, %v1716_v8 }
 0x43b   : > { %v1722_v50 = vpop.f32.mrf.mxu0 }
 0x43c   : > { %v1740_v26 = vpack.c.bf16 %v1722_v50, %v1718_v29 }
 0x43e   : > { %1746 = vmatprep.subr.bf16.mxu1 %v1740_v26 }
 0x43f   : > { %1747 = vmatpush1.bf16.msra.mxu1 %v1739_v54 }
 0x440   : > { %1748 = vmatprep.subr.bf16.mxu1 %v1738_v27 }
 0x443   : > { %1749 = vmatpush1.bf16.msra.mxu1 %v1737_v20 }
 0x444   : > { %1750 = vmatprep.subr.bf16.mxu1 %v1736_v63 }
 0x447   : > { %1751 = vmatpush1.bf16.msra.mxu1 %v1735_v12 }
 0x448   : > { %1752 = vmatprep.subr.bf16.mxu1 %v1734_v61 }
 0x44b   : > { %1753 = vmatpush1.bf16.msra.mxu1 %v1733_v31 }
 0x44c   : > { %1754 = vmatprep.subr.bf16.mxu1 %v1732_v13 }
 0x44f   : > { %1755 = vmatpush1.bf16.msra.mxu1 %v1731_v19 }
 0x450   : > { %1756 = vmatprep.subr.bf16.mxu1 %v1730_v59 }
 0x453   : > { %1757 = vmatpush1.bf16.msra.mxu1 %v1729_v2 }
 0x454   : > { %1758 = vmatprep.subr.bf16.mxu1 %v1728_v34 }
 0x457   : > { %1759 = vmatpush1.bf16.msra.mxu1 %v1727_v39  ;;  %v1810_v39 = vpop.permute.xlu1 %1809 }
 0x458   : > { %1760 = vmatprep.subr.bf16.mxu1 %v1726_v41 }
 0x45b   : > { %1761 = vmatpush1.bf16.msra.mxu1 %v1725_v17 }
 0x45e   : > { %1779 = vmatmul.mubr.bf16.vlgmr.msra.gmra.mxu1 %v369_v57 }
 0x51e   : > { %v1780_v25 = vpop.f32.mrf.mxu1 }
 0x51f   : > { %v1781_v0 = vadd.f32 %v1780_v25, %v1744_v15 }
 0x520   : > { %v1782_v36 = vpop.f32.mrf.mxu1 }
 0x521   : > { %v1787_v38 = vmul.f32 %v1781_v0, %v1781_v0  ;;  %v1783_v23 = vadd.f32 %v1782_v36, %v1744_v15 }
 0x522   : > { %v1784_v53 = vpop.f32.mrf.mxu1 }
 0x523   : > { %v1789_v21 = vrot.slane %v1787_v38, 4  ;;  %v1788_v42 = vmul.f32 %v1783_v23, %v1783_v23 }
 0x524   : > { %v1785_v51 = vpop.f32.mrf.mxu1 }
 0x525   : > { %v1790_v5 = vadd.f32 %v1789_v21, %v1787_v38  ;;  %v1795_v18 = vrot.slane %v1788_v42, 4 }
 0x527   : > { %v1791_v22 = vrot.slane %v1790_v5, 2  ;;  %v1796_v33 = vadd.f32 %v1795_v18, %v1788_v42 }
 0x529   : > { %v1792_v49 = vadd.f32 %v1791_v22, %v1790_v5  ;;  %v1797_v55 = vrot.slane %v1796_v33, 2 }
 0x52b   : > { %v1793_v47 = vrot.slane %v1792_v49, 1  ;;  %v1798_v56 = vadd.f32 %v1797_v55, %v1796_v33 }
 0x52d   : > { %v1794_v17 = vadd.f32 %v1793_v47, %v1792_v49  ;;  %v1799_v46 = vrot.slane %v1798_v56, 1 }
 0x52f   : > { %v1801_v41 = vmax.f32 %v1794_v17, 1e-24  ;;  %v1800_v30 = vadd.f32 %v1799_v46, %v1798_v56 }
 0x531   : > { %2199 = vrsqrt.f32 %v1801_v41  ;;  %v1802_v3 = vmax.f32 %v1800_v30, 1e-24 }
 0x533   : > { %2201 = vrsqrt.f32 %v1802_v3 }
 0x53e   : > { %v2200_v58 = vpop.eup %2199 }
 0x53f   : > { %v1805_v35 = vmul.f32 %v2200_v58, %v1781_v0 }
 0x540   : > { %v2202_v34 = vpop.eup %2201 }
 0x541   : > { %v1806_v4 = vmul.f32 %v2202_v34, %v1783_v23  ;;  %v1812_v28 = vmul.f32 %v1810_v39, %v1805_v35 }
 0x543   : > { %v1813_v9 = vmul.f32 %v1810_v39, %v1806_v4  ;;  %1814 = vst [vmem:[%s298_s20] sm:$0xff] %v1812_v28 }
 0x545   : > { %1815 = vst [vmem:[%s298_s20 + $0x8] sm:$0xff] %v1813_v9 }
 0x546   : > { %2216 = shalt.err (!%p2213_p3)
}
 0x547   : > { %s2217_s13 = scalar_lea.hbm %s1829_s24, 256  ;;  %s2221_s19 = scalar_lea.hbm %s3124_s8, 512 }
 0x548   : > { %p2218_p4 = scmp.ne.s32.totalorder %s1829_s24, %s2217_s13  ;;  %p2222_p9 = scmp.lt.s32.totalorder %s1829_s24, %s3124_s8 }
 0x549   : > { %p2223_p10 = scmp.lt.s32.totalorder %s2221_s19, %s2217_s13 }
 0x54a   : > { %p2219_p7 = pnand %p2218_p4, %p2350_p5 }
 0x54b   : > { %p2224_p11 = por %p2223_p10, %p2222_p9 }
 0x54c   : > { %p2220_p8 = pneg %p2219_p7 }
 0x54e   : > { %p2225_p12 = pnand %p2224_p11, %p2220_p8 }
 0x550   : > { %2228 = shalt.err (!%p2225_p12)
}
 0x551   : > { %1957 = dma.vmem_to_hbm [thread:$0]  (%p2350_p5), %s1832_s21, 256, %s1829_s24, %s1817_s25  }
 0x552 PF: > { %p1963_p13 = scmp.ge.s32.totalorder %s2263_s30, 2  ;;  %s1843_s23 = sand.u32 1, %s2251_s27  }
 0x553   : > { %s1844_s26 = scalar_lea.sflag [#allocation3], %s1843_s23 }
 0x554   : > { %p1960_p0 = pnand %p1963_p13, %p2354_p6 }
 0x556   : > { %p1961_p1 = pneg %p1960_p0 }
 0x558   : > { %2246 = dma.done.wait (%p1961_p1), %s1844_s26, 256  }
 0x559   : > { %2248 = vsyncadd (%p1961_p1), %s1844_s26, 4294967040  ;;  %p18_p2 = scmp.ge.s32.totalorder %s2337_s11, 4   ;;  %s3221_s27 = smov %s2255_s28 }
 0x55a   : > { %s3222_s28 = smov %s2259_s29  ;;  %s3223_s29 = smov %s2348_s14 }
 0x55b   : > { %s3224_s30 = smov %s2337_s11  ;;  %20 = sbr.rel (!%p18_p2) target bundleno = 3 (0x3), region = 87 }
 0x560   :  { %1849 = vsyncpa [#allocation3], 1 }
 0x561   :  { %1851 = vsyncpa [#allocation3 + $0x1], 1 }

</bundles_post_ra>
